<compile_context>
chip_gen: v7x
topology: tpu7x:2x2x1
jax: 0.10.0
libtpu: 0.0.40
codegen_flags: <defaults>
</compile_context>

<pallas_src>
import jax
import jax.numpy as jnp
from jax.experimental import pallas as pl
from jax.experimental.pallas import tpu as pltpu

LAYER_SIZES = [784, 512, 256, 128, 64, 32, 10]
K_PAD = 896          # 784 padded to 7*128 (lane-aligned K for fc1)
OUT_PAD = 128        # 10-class logits padded to one full lane group
NUM_CLASSES = 10


def _round_up(a, m):
    return (a + m - 1) // m * m


def mlp_kernel(x_ref,
               w1_ref, b1_ref, w2_ref, b2_ref, w3_ref, b3_ref,
               w4_ref, b4_ref, w5_ref, b5_ref, w6_ref, b6_ref,
               out_ref):
    """One batch tile of the fused 6-layer MLP + log_softmax.

    x_ref:   (TM, K_PAD) bf16 activation tile.
    wN_ref:  (in, out)  bf16 weights, resident in VMEM across batch tiles.
    bN_ref:  (1, out)   f32 biases.
    out_ref: (TM, OUT_PAD) f32 log-probs (columns >= 10 are padding / -inf).
    """
    def linear(h, w_ref, b_ref):
        # bf16 x bf16 on the MXU, f32 accumulation; bias added in f32.
        return jnp.dot(h.astype(jnp.bfloat16), w_ref[...],
                       preferred_element_type=jnp.float32) + b_ref[...]

    h = x_ref[...]
    h = jnp.maximum(linear(h, w1_ref, b1_ref), 0.0)
    h = jnp.maximum(linear(h, w2_ref, b2_ref), 0.0)
    h = jnp.maximum(linear(h, w3_ref, b3_ref), 0.0)
    h = jnp.maximum(linear(h, w4_ref, b4_ref), 0.0)
    h = jnp.maximum(linear(h, w5_ref, b5_ref), 0.0)
    logits = linear(h, w6_ref, b6_ref)                   # (TM, OUT_PAD)

    # Mask padded class columns so they don't perturb the log_softmax.
    col = jax.lax.broadcasted_iota(jnp.int32, logits.shape, dimension=1)
    logits = jnp.where(col < NUM_CLASSES, logits, -jnp.inf)

    # log_softmax along the class axis.
    m = jnp.max(logits, axis=-1, keepdims=True)
    shifted = logits - m
    lse = jnp.log(jnp.sum(jnp.exp(shifted), axis=-1, keepdims=True))
    out_ref[...] = shifted - lse


def prepare_params(params):
    """Pad / cast raw (in, out) f32 params for the kernel.

    - W1 rows padded 784 -> 896 (zeros; matches the zero-padded input columns).
    - W6 / b6 columns padded 10 -> 128 (lane-dense logits and output stores).
    - Weights cast to bf16; biases kept f32.
    """
    prepared = []
    for i, (w, b) in enumerate(params):
        w = w.astype(jnp.float32)
        b = b.astype(jnp.float32)
        if i == 0:
            w = jnp.pad(w, ((0, K_PAD - w.shape[0]), (0, 0)))
        if i == len(params) - 1:
            w = jnp.pad(w, ((0, 0), (0, OUT_PAD - w.shape[1])))
            b = jnp.pad(b, ((0, 0), (0, OUT_PAD - b.shape[1])))
        prepared.append((w.astype(jnp.bfloat16), b))
    return prepared


@jax.jit
def net_forward(x, prepared_params):
    """x: [B, 1, 28, 28] float (NCHW, like the PyTorch module).
    prepared_params: output of prepare_params(). Returns [B, 10] f32 log-probs."""
    B = x.shape[0]
    x2d = x.astype(jnp.float32).reshape(-1, 784)          # x.view(-1, 784)

    # Batch tiling: tall MXU-friendly tiles, batch padded so the grid divides.
    TM = min(256, _round_up(B, 8))
    pad_b = _round_up(B, TM)
    xp = jnp.pad(x2d, ((0, pad_b - B), (0, K_PAD - 784))).astype(jnp.bfloat16)

    flat_params = []
    for w, b in prepared_params:
        flat_params.extend([w, b])

    # x / out are tiled over batch; weights & biases use constant index maps so
    # they stay resident in VMEM across batch tiles (one fetch per call).
    in_specs = [pl.BlockSpec((TM, K_PAD), lambda i: (i, 0))]
    for p in flat_params:
        in_specs.append(pl.BlockSpec(p.shape, lambda i: (0, 0)))
    out_specs = pl.BlockSpec((TM, OUT_PAD), lambda i: (i, 0))

    out_padded = pl.pallas_call(
        mlp_kernel,
        out_shape=jax.ShapeDtypeStruct((pad_b, OUT_PAD), jnp.float32),
        grid=(pad_b // TM,),
        in_specs=in_specs,
        out_specs=out_specs,
        compiler_params=pltpu.CompilerParams(
            # Batch tiles are independent -> shard across the 2 TCs on v7x.
            dimension_semantics=("parallel",),
            # Footprint is a few MiB; 32 MiB gives double-buffer headroom on
            # v5e (16 MiB scoped default) without grabbing the whole 64 MiB of
            # physical VMEM on v7x.
            vmem_limit_bytes=32 << 20,
        ),
    )(xp, *flat_params)

    return out_padded[:B, :NUM_CLASSES]


def init_params(key):
    """Deterministic init mimicking nn.Linear's scale; weights stored (in, out)."""
    params = []
    for i in range(len(LAYER_SIZES) - 1):
        fan_in, fan_out = LAYER_SIZES[i], LAYER_SIZES[i + 1]
        key, kw, kb = jax.random.split(key, 3)
        bound = 1.0 / jnp.sqrt(fan_in)
        w = jax.random.uniform(kw, (fan_in, fan_out), jnp.float32, -bound, bound)
        b = jax.random.uniform(kb, (1, fan_out), jnp.float32, -bound, bound)
        params.append((w, b))
    return params


def reference_forward(x, params):
    """Pure-JAX reference mirroring the kernel math (bf16 matmuls, f32 accum)."""
    h = x.astype(jnp.float32).reshape(-1, 784)
    for i, (w, b) in enumerate(params):
        h = jnp.dot(h.astype(jnp.bfloat16), w.astype(jnp.bfloat16),
                    preferred_element_type=jnp.float32) + b.astype(jnp.float32)
        if i < len(params) - 1:
            h = jnp.maximum(h, 0.0)
    return jax.nn.log_softmax(h, axis=1)


if __name__ == "__main__":
    key = jax.random.PRNGKey(0)
    key, kx = jax.random.split(key)

    batch = 8
    x = jax.random.normal(kx, (batch, 1, 28, 28), jnp.float32)  # NCHW like PyTorch
    params = init_params(key)
    prepared = prepare_params(params)

    out = jax.block_until_ready(net_forward(x, prepared))
    ref = reference_forward(x, params)
    assert out.shape == (batch, 10), out.shape
    assert jnp.allclose(out, ref, atol=2e-2, rtol=2e-2), "mismatch vs reference"
    # rows of log_softmax should exp-sum to 1
    assert jnp.allclose(jnp.sum(jnp.exp(out), axis=1), 1.0, atol=1e-3)

    # Exercise the batch grid + padding path (300 rows -> 2 tiles of 256).
    key, kx2 = jax.random.split(key)
    x_big = jax.random.normal(kx2, (300, 1, 28, 28), jnp.float32)
    out_big = jax.block_until_ready(net_forward(x_big, prepared))
    ref_big = reference_forward(x_big, params)
    assert out_big.shape == (300, 10), out_big.shape
    assert jnp.allclose(out_big, ref_big, atol=2e-2, rtol=2e-2), "mismatch (big batch)"
    assert jnp.allclose(jnp.sum(jnp.exp(out_big), axis=1), 1.0, atol=1e-3)

    print("KERNEL_OK")
</pallas_src>

<mosaic_0001>
module attributes {stable_mosaic.version = 11 : i64} {
  func.func @mlp_kernel(%arg0: i32, %arg1: memref<8x896xbf16, #tpu.memory_space<vmem>>, %arg2: memref<896x512xbf16, #tpu.memory_space<vmem>>, %arg3: memref<1x512xf32, #tpu.memory_space<vmem>>, %arg4: memref<512x256xbf16, #tpu.memory_space<vmem>>, %arg5: memref<1x256xf32, #tpu.memory_space<vmem>>, %arg6: memref<256x128xbf16, #tpu.memory_space<vmem>>, %arg7: memref<1x128xf32, #tpu.memory_space<vmem>>, %arg8: memref<128x64xbf16, #tpu.memory_space<vmem>>, %arg9: memref<1x64xf32, #tpu.memory_space<vmem>>, %arg10: memref<64x32xbf16, #tpu.memory_space<vmem>>, %arg11: memref<1x32xf32, #tpu.memory_space<vmem>>, %arg12: memref<32x128xbf16, #tpu.memory_space<vmem>>, %arg13: memref<1x128xf32, #tpu.memory_space<vmem>>, %arg14: memref<8x128xf32, #tpu.memory_space<vmem>>) attributes {dimension_semantics = [#tpu.dimension_semantics<parallel>], iteration_bounds = array<i64: 1>, scalar_prefetch = 0 : i64, scratch_operands = 0 : i64, tpu.core_type = #tpu.core_type<tc>, window_params = [{transform_indices = @transform_0, window_bounds = array<i64: 8, 896>}, {pipeline_mode = #tpu.pipeline_mode<synchronous>, transform_indices = @transform_1, window_bounds = array<i64: 896, 512>}, {pipeline_mode = #tpu.pipeline_mode<synchronous>, transform_indices = @transform_2, window_bounds = array<i64: 1, 512>}, {pipeline_mode = #tpu.pipeline_mode<synchronous>, transform_indices = @transform_3, window_bounds = array<i64: 512, 256>}, {pipeline_mode = #tpu.pipeline_mode<synchronous>, transform_indices = @transform_4, window_bounds = array<i64: 1, 256>}, {pipeline_mode = #tpu.pipeline_mode<synchronous>, transform_indices = @transform_5, window_bounds = array<i64: 256, 128>}, {pipeline_mode = #tpu.pipeline_mode<synchronous>, transform_indices = @transform_6, window_bounds = array<i64: 1, 128>}, {pipeline_mode = #tpu.pipeline_mode<synchronous>, transform_indices = @transform_7, window_bounds = array<i64: 128, 64>}, {pipeline_mode = #tpu.pipeline_mode<synchronous>, transform_indices = @transform_8, window_bounds = array<i64: 1, 64>}, {pipeline_mode = #tpu.pipeline_mode<synchronous>, transform_indices = @transform_9, window_bounds = array<i64: 64, 32>}, {pipeline_mode = #tpu.pipeline_mode<synchronous>, transform_indices = @transform_10, window_bounds = array<i64: 1, 32>}, {pipeline_mode = #tpu.pipeline_mode<synchronous>, transform_indices = @transform_11, window_bounds = array<i64: 32, 128>}, {pipeline_mode = #tpu.pipeline_mode<synchronous>, transform_indices = @transform_12, window_bounds = array<i64: 1, 128>}, {transform_indices = @transform_13, window_bounds = array<i64: 8, 128>}]} {
    %c0 = arith.constant 0 : index
    %c0_0 = arith.constant 0 : index
    %0 = vector.load %arg1[%c0, %c0_0] : memref<8x896xbf16, #tpu.memory_space<vmem>>, vector<8x896xbf16>
    %c0_1 = arith.constant 0 : index
    %c0_2 = arith.constant 0 : index
    %1 = vector.load %arg2[%c0_1, %c0_2] : memref<896x512xbf16, #tpu.memory_space<vmem>>, vector<896x512xbf16>
    %cst = arith.constant dense<0.000000e+00> : vector<8x512xf32>
    %2 = tpu.matmul %0, %1, %cst {dimension_numbers = #tpu.dot_dimension_numbers<[1], [0], [0], [1], [0, 0, 1, 1], [], []>} : vector<8x896xbf16>, vector<896x512xbf16>, vector<8x512xf32> -> vector<8x512xf32>
    %c0_3 = arith.constant 0 : index
    %c0_4 = arith.constant 0 : index
    %3 = vector.load %arg3[%c0_3, %c0_4] : memref<1x512xf32, #tpu.memory_space<vmem>>, vector<1x512xf32>
    %4 = vector.broadcast %3 : vector<1x512xf32> to vector<8x512xf32>
    %5 = arith.addf %2, %4 : vector<8x512xf32>
    %cst_5 = arith.constant 0.000000e+00 : f32
    %6 = vector.broadcast %cst_5 : f32 to vector<8x512xf32>
    %7 = arith.maximumf %5, %6 : vector<8x512xf32>
    %8 = arith.truncf %7 : vector<8x512xf32> to vector<8x512xbf16>
    %c0_6 = arith.constant 0 : index
    %c0_7 = arith.constant 0 : index
    %9 = vector.load %arg4[%c0_6, %c0_7] : memref<512x256xbf16, #tpu.memory_space<vmem>>, vector<512x256xbf16>
    %cst_8 = arith.constant dense<0.000000e+00> : vector<8x256xf32>
    %10 = tpu.matmul %8, %9, %cst_8 {dimension_numbers = #tpu.dot_dimension_numbers<[1], [0], [0], [1], [0, 0, 1, 1], [], []>} : vector<8x512xbf16>, vector<512x256xbf16>, vector<8x256xf32> -> vector<8x256xf32>
    %c0_9 = arith.constant 0 : index
    %c0_10 = arith.constant 0 : index
    %11 = vector.load %arg5[%c0_9, %c0_10] : memref<1x256xf32, #tpu.memory_space<vmem>>, vector<1x256xf32>
    %12 = vector.broadcast %11 : vector<1x256xf32> to vector<8x256xf32>
    %13 = arith.addf %10, %12 : vector<8x256xf32>
    %cst_11 = arith.constant 0.000000e+00 : f32
    %14 = vector.broadcast %cst_11 : f32 to vector<8x256xf32>
    %15 = arith.maximumf %13, %14 : vector<8x256xf32>
    %16 = arith.truncf %15 : vector<8x256xf32> to vector<8x256xbf16>
    %c0_12 = arith.constant 0 : index
    %c0_13 = arith.constant 0 : index
    %17 = vector.load %arg6[%c0_12, %c0_13] : memref<256x128xbf16, #tpu.memory_space<vmem>>, vector<256x128xbf16>
    %cst_14 = arith.constant dense<0.000000e+00> : vector<8x128xf32>
    %18 = tpu.matmul %16, %17, %cst_14 {dimension_numbers = #tpu.dot_dimension_numbers<[1], [0], [0], [1], [0, 0, 1, 1], [], []>} : vector<8x256xbf16>, vector<256x128xbf16>, vector<8x128xf32> -> vector<8x128xf32>
    %c0_15 = arith.constant 0 : index
    %c0_16 = arith.constant 0 : index
    %19 = vector.load %arg7[%c0_15, %c0_16] : memref<1x128xf32, #tpu.memory_space<vmem>>, vector<1x128xf32>
    %20 = vector.broadcast %19 : vector<1x128xf32> to vector<8x128xf32>
    %21 = arith.addf %18, %20 : vector<8x128xf32>
    %cst_17 = arith.constant 0.000000e+00 : f32
    %22 = vector.broadcast %cst_17 : f32 to vector<8x128xf32>
    %23 = arith.maximumf %21, %22 : vector<8x128xf32>
    %24 = arith.truncf %23 : vector<8x128xf32> to vector<8x128xbf16>
    %c0_18 = arith.constant 0 : index
    %c0_19 = arith.constant 0 : index
    %25 = vector.load %arg8[%c0_18, %c0_19] : memref<128x64xbf16, #tpu.memory_space<vmem>>, vector<128x64xbf16>
    %cst_20 = arith.constant dense<0.000000e+00> : vector<8x64xf32>
    %26 = tpu.matmul %24, %25, %cst_20 {dimension_numbers = #tpu.dot_dimension_numbers<[1], [0], [0], [1], [0, 0, 1, 1], [], []>} : vector<8x128xbf16>, vector<128x64xbf16>, vector<8x64xf32> -> vector<8x64xf32>
    %c0_21 = arith.constant 0 : index
    %c0_22 = arith.constant 0 : index
    %27 = vector.load %arg9[%c0_21, %c0_22] : memref<1x64xf32, #tpu.memory_space<vmem>>, vector<1x64xf32>
    %28 = vector.broadcast %27 : vector<1x64xf32> to vector<8x64xf32>
    %29 = arith.addf %26, %28 : vector<8x64xf32>
    %cst_23 = arith.constant 0.000000e+00 : f32
    %30 = vector.broadcast %cst_23 : f32 to vector<8x64xf32>
    %31 = arith.maximumf %29, %30 : vector<8x64xf32>
    %32 = arith.truncf %31 : vector<8x64xf32> to vector<8x64xbf16>
    %c0_24 = arith.constant 0 : index
    %c0_25 = arith.constant 0 : index
    %33 = vector.load %arg10[%c0_24, %c0_25] : memref<64x32xbf16, #tpu.memory_space<vmem>>, vector<64x32xbf16>
    %cst_26 = arith.constant dense<0.000000e+00> : vector<8x32xf32>
    %34 = tpu.matmul %32, %33, %cst_26 {dimension_numbers = #tpu.dot_dimension_numbers<[1], [0], [0], [1], [0, 0, 1, 1], [], []>} : vector<8x64xbf16>, vector<64x32xbf16>, vector<8x32xf32> -> vector<8x32xf32>
    %c0_27 = arith.constant 0 : index
    %c0_28 = arith.constant 0 : index
    %35 = vector.load %arg11[%c0_27, %c0_28] : memref<1x32xf32, #tpu.memory_space<vmem>>, vector<1x32xf32>
    %36 = vector.broadcast %35 : vector<1x32xf32> to vector<8x32xf32>
    %37 = arith.addf %34, %36 : vector<8x32xf32>
    %cst_29 = arith.constant 0.000000e+00 : f32
    %38 = vector.broadcast %cst_29 : f32 to vector<8x32xf32>
    %39 = arith.maximumf %37, %38 : vector<8x32xf32>
    %40 = arith.truncf %39 : vector<8x32xf32> to vector<8x32xbf16>
    %c0_30 = arith.constant 0 : index
    %c0_31 = arith.constant 0 : index
    %41 = vector.load %arg12[%c0_30, %c0_31] : memref<32x128xbf16, #tpu.memory_space<vmem>>, vector<32x128xbf16>
    %cst_32 = arith.constant dense<0.000000e+00> : vector<8x128xf32>
    %42 = tpu.matmul %40, %41, %cst_32 {dimension_numbers = #tpu.dot_dimension_numbers<[1], [0], [0], [1], [0, 0, 1, 1], [], []>} : vector<8x32xbf16>, vector<32x128xbf16>, vector<8x128xf32> -> vector<8x128xf32>
    %c0_33 = arith.constant 0 : index
    %c0_34 = arith.constant 0 : index
    %43 = vector.load %arg13[%c0_33, %c0_34] : memref<1x128xf32, #tpu.memory_space<vmem>>, vector<1x128xf32>
    %44 = vector.broadcast %43 : vector<1x128xf32> to vector<8x128xf32>
    %45 = arith.addf %42, %44 : vector<8x128xf32>
    %46 = tpu.iota {dimensions = array<i32: 1>} : vector<8x128xi32>
    %c10_i32 = arith.constant 10 : i32
    %47 = vector.broadcast %c10_i32 : i32 to vector<8x128xi32>
    %48 = arith.cmpi slt, %46, %47 : vector<8x128xi32>
    %cst_35 = arith.constant 0xFF800000 : f32
    %49 = vector.broadcast %cst_35 : f32 to vector<8x128xf32>
    %50 = arith.select %48, %45, %49 : vector<8x128xi1>, vector<8x128xf32>
    %cst_36 = arith.constant dense<0xFF800000> : vector<8xf32>
    %51 = vector.multi_reduction <maximumf>, %50, %cst_36 [1] : vector<8x128xf32> to vector<8xf32>
    %52 = vector.shape_cast %51 : vector<8xf32> to vector<8x1xf32>
    %53 = vector.broadcast %52 : vector<8x1xf32> to vector<8x128xf32>
    %54 = arith.subf %50, %53 : vector<8x128xf32>
    %55 = math.exp %54 : vector<8x128xf32>
    %cst_37 = arith.constant dense<0.000000e+00> : vector<8xf32>
    %56 = vector.multi_reduction <add>, %55, %cst_37 [1] : vector<8x128xf32> to vector<8xf32>
    %57 = vector.shape_cast %56 : vector<8xf32> to vector<8x1xf32>
    %58 = math.log %57 : vector<8x1xf32>
    %59 = vector.broadcast %58 : vector<8x1xf32> to vector<8x128xf32>
    %60 = arith.subf %54, %59 : vector<8x128xf32>
    %c0_38 = arith.constant 0 : index
    %c0_39 = arith.constant 0 : index
    %61 = vector.load %arg14[%c0_38, %c0_39] : memref<8x128xf32, #tpu.memory_space<vmem>>, vector<8x128xf32>
    tpu.vector_store %arg14[%c0_38, %c0_39], %60 {strides = array<i32>} : memref<8x128xf32, #tpu.memory_space<vmem>>, vector<8x128xf32>,
    return
  }
  func.func @transform_0(%arg0: i32) -> (i32, i32) {
    %c0_i32 = arith.constant 0 : i32
    %c0_i32_0 = arith.constant 0 : i32
    return %arg0, %c0_i32 : i32, i32
  }
  func.func @transform_1(%arg0: i32) -> (i32, i32) {
    %c0_i32 = arith.constant 0 : i32
    %c0_i32_0 = arith.constant 0 : i32
    %c0_i32_1 = arith.constant 0 : i32
    return %c0_i32, %c0_i32_0 : i32, i32
  }
  func.func @transform_2(%arg0: i32) -> (i32, i32) {
    %c0_i32 = arith.constant 0 : i32
    %c0_i32_0 = arith.constant 0 : i32
    %c0_i32_1 = arith.constant 0 : i32
    return %c0_i32, %c0_i32_0 : i32, i32
  }
  func.func @transform_3(%arg0: i32) -> (i32, i32) {
    %c0_i32 = arith.constant 0 : i32
    %c0_i32_0 = arith.constant 0 : i32
    %c0_i32_1 = arith.constant 0 : i32
    return %c0_i32, %c0_i32_0 : i32, i32
  }
  func.func @transform_4(%arg0: i32) -> (i32, i32) {
    %c0_i32 = arith.constant 0 : i32
    %c0_i32_0 = arith.constant 0 : i32
    %c0_i32_1 = arith.constant 0 : i32
    return %c0_i32, %c0_i32_0 : i32, i32
  }
  func.func @transform_5(%arg0: i32) -> (i32, i32) {
    %c0_i32 = arith.constant 0 : i32
    %c0_i32_0 = arith.constant 0 : i32
    %c0_i32_1 = arith.constant 0 : i32
    return %c0_i32, %c0_i32_0 : i32, i32
  }
  func.func @transform_6(%arg0: i32) -> (i32, i32) {
    %c0_i32 = arith.constant 0 : i32
    %c0_i32_0 = arith.constant 0 : i32
    %c0_i32_1 = arith.constant 0 : i32
    return %c0_i32, %c0_i32_0 : i32, i32
  }
  func.func @transform_7(%arg0: i32) -> (i32, i32) {
    %c0_i32 = arith.constant 0 : i32
    %c0_i32_0 = arith.constant 0 : i32
    %c0_i32_1 = arith.constant 0 : i32
    return %c0_i32, %c0_i32_0 : i32, i32
  }
  func.func @transform_8(%arg0: i32) -> (i32, i32) {
    %c0_i32 = arith.constant 0 : i32
    %c0_i32_0 = arith.constant 0 : i32
    %c0_i32_1 = arith.constant 0 : i32
    return %c0_i32, %c0_i32_0 : i32, i32
  }
  func.func @transform_9(%arg0: i32) -> (i32, i32) {
    %c0_i32 = arith.constant 0 : i32
    %c0_i32_0 = arith.constant 0 : i32
    %c0_i32_1 = arith.constant 0 : i32
    return %c0_i32, %c0_i32_0 : i32, i32
  }
  func.func @transform_10(%arg0: i32) -> (i32, i32) {
    %c0_i32 = arith.constant 0 : i32
    %c0_i32_0 = arith.constant 0 : i32
    %c0_i32_1 = arith.constant 0 : i32
    return %c0_i32, %c0_i32_0 : i32, i32
  }
  func.func @transform_11(%arg0: i32) -> (i32, i32) {
    %c0_i32 = arith.constant 0 : i32
    %c0_i32_0 = arith.constant 0 : i32
    %c0_i32_1 = arith.constant 0 : i32
    return %c0_i32, %c0_i32_0 : i32, i32
  }
  func.func @transform_12(%arg0: i32) -> (i32, i32) {
    %c0_i32 = arith.constant 0 : i32
    %c0_i32_0 = arith.constant 0 : i32
    %c0_i32_1 = arith.constant 0 : i32
    return %c0_i32, %c0_i32_0 : i32, i32
  }
  func.func @transform_13(%arg0: i32) -> (i32, i32) {
    %c0_i32 = arith.constant 0 : i32
    %c0_i32_0 = arith.constant 0 : i32
    return %arg0, %c0_i32 : i32, i32
  }
}

</mosaic_0001>

<bundles_post_ra>
// kernel: net_forward.1
= control target key start
LH: loop header
LB: loop body
LE: loop exit
PB: predicated region body
PF: predicated region fallthrough
CT: control target
= control target key end

     0   :  { %18 = vsyncpa [#allocation3], 0  ;;  %s4204_s0 = inlined_call_operand.vmem [shape: bf16[8,896], index: 0, kind: input, shape index: {}]   ;;  %s4205_s1 = inlined_call_operand.hbm [shape: bf16[896,512], index: 1, kind: input, shape index: {}]   ;;  %s4206_s2 = inlined_call_operand.vmem [shape: f32[1,512], index: 2, kind: input, shape index: {}]   ;;  %s4207_s3 = inlined_call_operand.vmem [shape: bf16[512,256], index: 3, kind: input, shape index: {}]   ;;  %s4208_s4 = inlined_call_operand.vmem [shape: f32[1,256], index: 4, kind: input, shape index: {}]   ;;  %s4209_s5 = inlined_call_operand.vmem [shape: bf16[256,128], index: 5, kind: input, shape index: {}]   ;;  %s4210_s6 = inlined_call_operand.vmem [shape: f32[1,128], index: 6, kind: input, shape index: {}]   ;;  %s4211_s7 = inlined_call_operand.vmem [shape: bf16[128,64], index: 7, kind: input, shape index: {}]   ;;  %s4212_s8 = inlined_call_operand.vmem [shape: f32[1,64], index: 8, kind: input, shape index: {}]   ;;  %s4213_s9 = inlined_call_operand.vmem [shape: bf16[64,32], index: 9, kind: input, shape index: {}]   ;;  %s4214_s10 = inlined_call_operand.vmem [shape: f32[1,32], index: 10, kind: input, shape index: {}]   ;;  %s4215_s11 = inlined_call_operand.vmem [shape: bf16[32,128], index: 11, kind: input, shape index: {}]   ;;  %s4216_s12 = inlined_call_operand.vmem [shape: f32[1,128], index: 12, kind: input, shape index: {}]   ;;  %s4217_s13 = inlined_call_operand.hbm [shape: f32[8,128], index: 13, kind: output, shape index: {}]  }
   0x1   :  { %19 = vsyncpa [#allocation4], 0  ;;  %s3716_s25 = smov [#allocation2]   ;;  %s3668_s29 = scalar_lea.hbm %s4205_s1, 28672 }
   0x2   :  { %s27_s26 = sshll.u32 %s3716_s25, 4  ;;  %p3669_p0 = scmp.ne.s32.totalorder %s4205_s1, %s3668_s29  ;;  %s28_s26 = int_to_ptr.vmem [resolvable:$true] %s27_s26 }
   0x3   :  { %p3672_p1 = scmp.lt.u32.totalorder %s3668_s29, %s4205_s1 }
   0x5   :  { %p3674_p2 = pnand %p3672_p1, %p3669_p0 }
   0x7   :  { %3677 = shalt.err (!%p3674_p2)
}
   0x8   :  { %s3678_s17 = scalar_lea.vmem %s28_s26, 28672  ;;  %p3683_p4 = scmp.lt.s32.totalorder %s28_s26, %s28_s26 }
   0x9   :  { %p3679_p3 = scmp.ne.s32.totalorder %s28_s26, %s3678_s17  ;;  %p3684_p5 = scmp.lt.s32.totalorder %s3678_s17, %s3678_s17 }
   0xb   :  { %p3685_p6 = por %p3684_p5, %p3683_p4 }
   0xd   :  { %p3686_p7 = pnand %p3685_p6, %p3679_p3 }
   0xf   :  { %3689 = shalt.err (!%p3686_p7)
}
  0x10   :  { %s3717_s18 = smov 256   ;;  %s3718_s19 = smov 16  }
  0x11   :  { %33 = dma.hbm_to_vmem [thread:$0]  %s4205_s1, 28672, %s28_s26, [#allocation3], %s3717_s18, %s3717_s18, %s3718_s19  }
  0x12   :  { %3712 = dma.done.wait [#allocation3], 28672  }
  0x13   :  { %3713 = vsyncadd [#allocation3], 4294938624  ;;  %v3719_v0 = vmov 0   ;;  %v3194_v1 = vld [vmem:[#allocation2 + $0x4] ss:$16 sps:$4 sm:$0xff]   ;;  %vm3721_vm0 = vmmov 0  }
  0x14   :  { %1610 = vmatprep.mubr.bf16.mxu1 %v3719_v0  ;;  %v3196_v2 = vld [vmem:[#allocation2 + $0x604] ss:$16 sps:$4 sm:$0xff]   ;;  %1455 = vmatprep.subr.bf16.mxu0 %v3194_v1  ;;  %v3198_v3 = vld [vmem:[#allocation2] ss:$16 sps:$4 sm:$0xff]   ;;  %v3247_v34 = vld [vmem:[#allocation2 + $0xc] ss:$16 sps:$4 sm:$0xff]  }
  0x15   :  { %v3199_v4 = vld [vmem:[#allocation2 + $0x600] ss:$16 sps:$4 sm:$0xff]   ;;  %1578 = vmatprep.subr.bf16.mxu1 %v3196_v2  ;;  %v3200_v5 = vld [vmem:[#allocation2 + $0x24] ss:$16 sps:$4 sm:$0xff]   ;;  %1456 = vmatpush1.bf16.msra.mxu0 %v3198_v3  ;;  %v3244_v35 = vld [vmem:[%s4204_s0 + $0x18] ss:$0 sps:$4 sm:$0xff]  }
  0x16   :  { %1579 = vmatpush1.bf16.msra.mxu1 %v3199_v4  ;;  %v3202_v6 = vld [vmem:[#allocation2 + $0x624] ss:$16 sps:$4 sm:$0xff]   ;;  %v3204_v7 = vld [vmem:[#allocation2 + $0x20] ss:$16 sps:$4 sm:$0xff]   ;;  %1457 = vmatprep.subr.bf16.mxu0 %v3200_v5  ;;  %v3245_v36 = vld [vmem:[#allocation2 + $0x8] ss:$16 sps:$4 sm:$0xff]  }
  0x17   :  { %v3205_v8 = vld [vmem:[#allocation2 + $0x620] ss:$16 sps:$4 sm:$0xff]   ;;  %1580 = vmatprep.subr.bf16.mxu1 %v3202_v6  ;;  %v3206_v9 = vld [vmem:[#allocation2 + $0x44] ss:$16 sps:$4 sm:$0xff]   ;;  %v3253_v39 = vld [vmem:[#allocation2 + $0x2c] ss:$16 sps:$4 sm:$0xff]  }
  0x18   :  { %v3208_v10 = vld [vmem:[#allocation2 + $0x644] ss:$16 sps:$4 sm:$0xff]   ;;  %v3210_v11 = vld [vmem:[#allocation2 + $0x40] ss:$16 sps:$4 sm:$0xff]   ;;  %v3251_v40 = vld [vmem:[#allocation2 + $0x28] ss:$16 sps:$4 sm:$0xff]  }
  0x19   :  { %v3211_v12 = vld [vmem:[#allocation2 + $0x640] ss:$16 sps:$4 sm:$0xff]   ;;  %1458 = vmatpush1.bf16.msra.mxu0 %v3204_v7  ;;  %v3212_v13 = vld [vmem:[#allocation2 + $0x64] ss:$16 sps:$4 sm:$0xff]   ;;  %v3259_v43 = vld [vmem:[#allocation2 + $0x4c] ss:$16 sps:$4 sm:$0xff]  }
  0x1a   :  { %1581 = vmatpush1.bf16.msra.mxu1 %v3205_v8  ;;  %1459 = vmatprep.subr.bf16.mxu0 %v3206_v9  ;;  %v3214_v14 = vld [vmem:[#allocation2 + $0x664] ss:$16 sps:$4 sm:$0xff]   ;;  %v3216_v15 = vld [vmem:[#allocation2 + $0x60] ss:$16 sps:$4 sm:$0xff]   ;;  %v3257_v44 = vld [vmem:[#allocation2 + $0x48] ss:$16 sps:$4 sm:$0xff]  }
  0x1b   :  { %1582 = vmatprep.subr.bf16.mxu1 %v3208_v10  ;;  %v3217_v16 = vld [vmem:[#allocation2 + $0x660] ss:$16 sps:$4 sm:$0xff]   ;;  %v3218_v17 = vld [vmem:[#allocation2 + $0x84] ss:$16 sps:$4 sm:$0xff]   ;;  %v3265_v47 = vld [vmem:[#allocation2 + $0x6c] ss:$16 sps:$4 sm:$0xff]  }
  0x1c   :  { %v3220_v18 = vld [vmem:[#allocation2 + $0x684] ss:$16 sps:$4 sm:$0xff]   ;;  %v3222_v19 = vld [vmem:[#allocation2 + $0x80] ss:$16 sps:$4 sm:$0xff]   ;;  %v3263_v48 = vld [vmem:[#allocation2 + $0x68] ss:$16 sps:$4 sm:$0xff]  }
  0x1d   :  { %1460 = vmatpush1.bf16.msra.mxu0 %v3210_v11  ;;  %v3223_v20 = vld [vmem:[#allocation2 + $0x680] ss:$16 sps:$4 sm:$0xff]   ;;  %v3224_v21 = vld [vmem:[#allocation2 + $0xa4] ss:$16 sps:$4 sm:$0xff]   ;;  %v3271_v53 = vld [vmem:[#allocation2 + $0x8c] ss:$16 sps:$4 sm:$0xff]  }
  0x1e   :  { %1583 = vmatpush1.bf16.msra.mxu1 %v3211_v12  ;;  %1461 = vmatprep.subr.bf16.mxu0 %v3212_v13  ;;  %v3226_v22 = vld [vmem:[#allocation2 + $0x6a4] ss:$16 sps:$4 sm:$0xff]   ;;  %v3228_v23 = vld [vmem:[#allocation2 + $0xa0] ss:$16 sps:$4 sm:$0xff]   ;;  %v3269_v54 = vld [vmem:[#allocation2 + $0x88] ss:$16 sps:$4 sm:$0xff]  }
  0x1f   :  { %1584 = vmatprep.subr.bf16.mxu1 %v3214_v14  ;;  %v3229_v24 = vld [vmem:[#allocation2 + $0x6a0] ss:$16 sps:$4 sm:$0xff]   ;;  %v3230_v25 = vld [vmem:[#allocation2 + $0xc4] ss:$16 sps:$4 sm:$0xff]   ;;  %v3277_v57 = vld [vmem:[#allocation2 + $0xac] ss:$16 sps:$4 sm:$0xff]  }
  0x20   :  { %v3232_v26 = vld [vmem:[#allocation2 + $0x6c4] ss:$16 sps:$4 sm:$0xff]   ;;  %v3234_v27 = vld [vmem:[#allocation2 + $0xc0] ss:$16 sps:$4 sm:$0xff]   ;;  %v3275_v58 = vld [vmem:[#allocation2 + $0xa8] ss:$16 sps:$4 sm:$0xff]  }
  0x21   :  { %1462 = vmatpush1.bf16.msra.mxu0 %v3216_v15  ;;  %v3235_v28 = vld [vmem:[#allocation2 + $0x6c0] ss:$16 sps:$4 sm:$0xff]   ;;  %v3236_v29 = vld [vmem:[#allocation2 + $0xe4] ss:$16 sps:$4 sm:$0xff]   ;;  %v3283_v61 = vld [vmem:[#allocation2 + $0xcc] ss:$16 sps:$4 sm:$0xff]  }
  0x22   :  { %1585 = vmatpush1.bf16.msra.mxu1 %v3217_v16  ;;  %1463 = vmatprep.subr.bf16.mxu0 %v3218_v17  ;;  %v3238_v30 = vld [vmem:[#allocation2 + $0x6e4] ss:$16 sps:$4 sm:$0xff]   ;;  %v3240_v31 = vld [vmem:[#allocation2 + $0xe0] ss:$16 sps:$4 sm:$0xff]   ;;  %v3281_v62 = vld [vmem:[#allocation2 + $0xc8] ss:$16 sps:$4 sm:$0xff]  }
  0x23   :  { %1586 = vmatprep.subr.bf16.mxu1 %v3220_v18  ;;  %v3241_v32 = vld [vmem:[#allocation2 + $0x6e0] ss:$16 sps:$4 sm:$0xff]   ;;  %v3242_v33 = vld [vmem:[#allocation2 + $0x104] ss:$16 sps:$4 sm:$0xff]   ;;  %v3289_v2 = vld [vmem:[#allocation2 + $0xec] ss:$16 sps:$4 sm:$0xff]  }
  0x24   :  { %v3248_v37 = vld [vmem:[#allocation2 + $0x100] ss:$16 sps:$4 sm:$0xff]   ;;  %v3249_v38 = vld [vmem:[#allocation2 + $0x124] ss:$16 sps:$4 sm:$0xff]   ;;  %v3287_v3 = vld [vmem:[#allocation2 + $0xe8] ss:$16 sps:$4 sm:$0xff]  }
  0x25   :  { %1464 = vmatpush1.bf16.msra.mxu0 %v3222_v19  ;;  %v3254_v41 = vld [vmem:[#allocation2 + $0x120] ss:$16 sps:$4 sm:$0xff]   ;;  %v3255_v42 = vld [vmem:[#allocation2 + $0x144] ss:$16 sps:$4 sm:$0xff]   ;;  %v3298_v6 = vld [vmem:[#allocation2 + $0x10c] ss:$16 sps:$4 sm:$0xff]  }
  0x26   :  { %1587 = vmatpush1.bf16.msra.mxu1 %v3223_v20  ;;  %1465 = vmatprep.subr.bf16.mxu0 %v3224_v21  ;;  %v3260_v45 = vld [vmem:[#allocation2 + $0x140] ss:$16 sps:$4 sm:$0xff]   ;;  %v3261_v46 = vld [vmem:[#allocation2 + $0x164] ss:$16 sps:$4 sm:$0xff]   ;;  %v3296_v9 = vld [vmem:[#allocation2 + $0x108] ss:$16 sps:$4 sm:$0xff]  }
  0x27   :  { %1588 = vmatprep.subr.bf16.mxu1 %v3226_v22  ;;  %v60_v49 = vld [vmem:[%s4204_s0] sm:$0xff]  ;;  %v3304_v11 = vld [vmem:[#allocation2 + $0x12c] ss:$16 sps:$4 sm:$0xff]   ;;  %v3302_v13 = vld [vmem:[#allocation2 + $0x128] ss:$16 sps:$4 sm:$0xff]   ;;  %vm2602_vm1 = vcmask 523264  }
  0x28   :  { %v3266_v50 = vld [vmem:[#allocation2 + $0x160] ss:$16 sps:$4 sm:$0xff]   ;;  %v3267_v51 = vld [vmem:[#allocation2 + $0x184] ss:$16 sps:$4 sm:$0xff]   ;;  %v2746_v52 = vcombine.high %v60_v49, %v60_v49  ;;  %v3812_v7 = vcombine.low %v60_v49, %v60_v49  ;;  %v3310_v15 = vld [vmem:[#allocation2 + $0x14c] ss:$16 sps:$4 sm:$0xff]  }
  0x29   :  { %1466 = vmatpush1.bf16.msra.mxu0 %v3228_v23  ;;  %v3272_v55 = vld [vmem:[#allocation2 + $0x180] ss:$16 sps:$4 sm:$0xff]   ;;  %v3273_v56 = vld [vmem:[#allocation2 + $0x1a4] ss:$16 sps:$4 sm:$0xff]   ;;  %v3308_v17 = vld [vmem:[#allocation2 + $0x148] ss:$16 sps:$4 sm:$0xff]  }
  0x2a   :  { %1589 = vmatpush1.bf16.msra.mxu1 %v3229_v24  ;;  %1467 = vmatprep.subr.bf16.mxu0 %v3230_v25  ;;  %v3278_v59 = vld [vmem:[#allocation2 + $0x1a0] ss:$16 sps:$4 sm:$0xff]   ;;  %v3279_v60 = vld [vmem:[#allocation2 + $0x1c4] ss:$16 sps:$4 sm:$0xff]   ;;  %v3316_v19 = vld [vmem:[#allocation2 + $0x16c] ss:$16 sps:$4 sm:$0xff]  }
  0x2b   :  { %1590 = vmatprep.subr.bf16.mxu1 %v3232_v26  ;;  %1487 = vmatprep.mubr.bf16.mxu0 %v2746_v52  ;;  %v3284_v63 = vld [vmem:[#allocation2 + $0x1c0] ss:$16 sps:$4 sm:$0xff]   ;;  %v3285_v1 = vld [vmem:[#allocation2 + $0x1e4] ss:$16 sps:$4 sm:$0xff]   ;;  %v3314_v21 = vld [vmem:[#allocation2 + $0x168] ss:$16 sps:$4 sm:$0xff]  }
  0x2c   :  { %v3290_v4 = vld [vmem:[#allocation2 + $0x1e0] ss:$16 sps:$4 sm:$0xff]   ;;  %v3295_v5 = vld [vmem:[#allocation2 + $0x204] ss:$16 sps:$4 sm:$0xff]   ;;  %v3322_v23 = vld [vmem:[#allocation2 + $0x18c] ss:$16 sps:$4 sm:$0xff]  }
  0x2d   :  { %1468 = vmatpush1.bf16.msra.mxu0 %v3234_v27  ;;  %v3293_v8 = vld [vmem:[#allocation2 + $0x200] ss:$16 sps:$4 sm:$0xff]   ;;  %v3301_v10 = vld [vmem:[#allocation2 + $0x224] ss:$16 sps:$4 sm:$0xff]   ;;  %v3320_v25 = vld [vmem:[#allocation2 + $0x188] ss:$16 sps:$4 sm:$0xff]  }
  0x2e   :  { %1591 = vmatpush1.bf16.msra.mxu1 %v3235_v28  ;;  %1469 = vmatprep.subr.bf16.mxu0 %v3236_v29  ;;  %v3299_v12 = vld [vmem:[#allocation2 + $0x220] ss:$16 sps:$4 sm:$0xff]   ;;  %v3307_v14 = vld [vmem:[#allocation2 + $0x244] ss:$16 sps:$4 sm:$0xff]   ;;  %v3328_v27 = vld [vmem:[#allocation2 + $0x1ac] ss:$16 sps:$4 sm:$0xff]  }
  0x2f   :  { %1592 = vmatprep.subr.bf16.mxu1 %v3238_v30  ;;  %v3305_v16 = vld [vmem:[#allocation2 + $0x240] ss:$16 sps:$4 sm:$0xff]   ;;  %v3313_v18 = vld [vmem:[#allocation2 + $0x264] ss:$16 sps:$4 sm:$0xff]   ;;  %v3326_v29 = vld [vmem:[#allocation2 + $0x1a8] ss:$16 sps:$4 sm:$0xff]  }
  0x30   :  { %v3311_v20 = vld [vmem:[#allocation2 + $0x260] ss:$16 sps:$4 sm:$0xff]   ;;  %v3319_v22 = vld [vmem:[#allocation2 + $0x284] ss:$16 sps:$4 sm:$0xff]   ;;  %v3358_v49 = vld [vmem:[#allocation2 + $0x24c] ss:$16 sps:$4 sm:$0xff]  }
  0x31   :  { %1470 = vmatpush1.bf16.msra.mxu0 %v3240_v31  ;;  %v3317_v24 = vld [vmem:[#allocation2 + $0x280] ss:$16 sps:$4 sm:$0xff]   ;;  %v3325_v26 = vld [vmem:[#allocation2 + $0x2a4] ss:$16 sps:$4 sm:$0xff]   ;;  %v3334_v31 = vld [vmem:[#allocation2 + $0x1cc] ss:$16 sps:$4 sm:$0xff]  }
  0x32   :  { %1593 = vmatpush1.bf16.msra.mxu1 %v3241_v32  ;;  %1471 = vmatprep.subr.bf16.mxu0 %v3242_v33  ;;  %v3323_v28 = vld [vmem:[#allocation2 + $0x2a0] ss:$16 sps:$4 sm:$0xff]   ;;  %v3331_v30 = vld [vmem:[#allocation2 + $0x2c4] ss:$16 sps:$4 sm:$0xff]   ;;  %v3818_v32 = vld [vmem:[%s4204_s0 + $0x8] sm:$0xff]  ;;  %vm2671_vm2 = vcmask 261120  }
  0x33   :  { %1619 = vmatprep.subr.bf16.mxu1 %v3247_v34  ;;  %v3329_v33 = vld [vmem:[#allocation2 + $0x2c0] ss:$16 sps:$4 sm:$0xff]   ;;  %v3332_v34 = vld [vmem:[#allocation2 + $0x1c8] ss:$16 sps:$4 sm:$0xff]  }
  0x35   :  { %1611 = vmatmul.mubr.bf16.vlgmr.msra.gmra.mrb[0].mxu1 %v3244_v35  ;;  %1472 = vmatpush1.bf16.msra.mxu0 %v3248_v37  ;;  %v2748_v35 = vcombine.high %v3818_v32, %v3818_v32  ;;  %v3340_v37 = vld [vmem:[#allocation2 + $0x1ec] ss:$16 sps:$4 sm:$0xff]  }
  0x36   :  { %1620 = vmatpush1.bf16.msra.mxu1 %v3245_v36  ;;  %1473 = vmatprep.subr.bf16.mxu0 %v3249_v38  ;;  %v3337_v36 = vld [vmem:[#allocation2 + $0x2e4] ss:$16 sps:$4 sm:$0xff]   ;;  %v3335_v38 = vld [vmem:[#allocation2 + $0x2e0] ss:$16 sps:$4 sm:$0xff]  }
  0x37   :  { %1621 = vmatprep.subr.bf16.mxu1 %v3253_v39  ;;  %1651 = vmatprep.mubr.bf16.mxu1 %v2746_v52  ;;  %v3338_v39 = vld [vmem:[#allocation2 + $0x1e8] ss:$16 sps:$4 sm:$0xff]   ;;  %v3361_v52 = vld [vmem:[#allocation2 + $0x364] ss:$16 sps:$4 sm:$0xff]  }
  0x39   :  { %1474 = vmatpush1.bf16.msra.mxu0 %v3254_v41  ;;  %v3346_v41 = vld [vmem:[#allocation2 + $0x20c] ss:$16 sps:$4 sm:$0xff]  }
  0x3a   :  { %1622 = vmatpush1.bf16.msra.mxu1 %v3251_v40  ;;  %1475 = vmatprep.subr.bf16.mxu0 %v3255_v42  ;;  %v3343_v40 = vld [vmem:[#allocation2 + $0x304] ss:$16 sps:$4 sm:$0xff]   ;;  %v3341_v42 = vld [vmem:[#allocation2 + $0x300] ss:$16 sps:$4 sm:$0xff]  }
  0x3b   :  { %1623 = vmatprep.subr.bf16.mxu1 %v3259_v43  ;;  %v3344_v43 = vld [vmem:[#allocation2 + $0x208] ss:$16 sps:$4 sm:$0xff]  }
  0x3d   :  { %1476 = vmatpush1.bf16.msra.mxu0 %v3260_v45  ;;  %v3352_v45 = vld [vmem:[#allocation2 + $0x22c] ss:$16 sps:$4 sm:$0xff]  }
  0x3e   :  { %1624 = vmatpush1.bf16.msra.mxu1 %v3257_v44  ;;  %1477 = vmatprep.subr.bf16.mxu0 %v3261_v46  ;;  %v3349_v44 = vld [vmem:[#allocation2 + $0x324] ss:$16 sps:$4 sm:$0xff]   ;;  %v3347_v46 = vld [vmem:[#allocation2 + $0x320] ss:$16 sps:$4 sm:$0xff]  }
  0x3f   :  { %1625 = vmatprep.subr.bf16.mxu1 %v3265_v47  ;;  %v3350_v47 = vld [vmem:[#allocation2 + $0x228] ss:$16 sps:$4 sm:$0xff]  }
  0x41   :  { %1478 = vmatpush1.bf16.msra.mxu0 %v3266_v50  ;;  %v3353_v50 = vld [vmem:[#allocation2 + $0x340] ss:$16 sps:$4 sm:$0xff]  }
  0x42   :  { %1626 = vmatpush1.bf16.msra.mxu1 %v3263_v48  ;;  %1479 = vmatprep.subr.bf16.mxu0 %v3267_v51  ;;  %v3355_v48 = vld [vmem:[#allocation2 + $0x344] ss:$16 sps:$4 sm:$0xff]   ;;  %v3356_v51 = vld [vmem:[#allocation2 + $0x248] ss:$16 sps:$4 sm:$0xff]  }
  0x43   :  { %1627 = vmatprep.subr.bf16.mxu1 %v3271_v53  ;;  %v3364_v53 = vld [vmem:[#allocation2 + $0x26c] ss:$16 sps:$4 sm:$0xff]  }
  0x45   :  { %1480 = vmatpush1.bf16.msra.mxu0 %v3272_v55  ;;  %v3362_v55 = vld [vmem:[#allocation2 + $0x268] ss:$16 sps:$4 sm:$0xff]  }
  0x46   :  { %1628 = vmatpush1.bf16.msra.mxu1 %v3269_v54  ;;  %1481 = vmatprep.subr.bf16.mxu0 %v3273_v56  ;;  %v3359_v54 = vld [vmem:[#allocation2 + $0x360] ss:$16 sps:$4 sm:$0xff]   ;;  %v3367_v56 = vld [vmem:[#allocation2 + $0x384] ss:$16 sps:$4 sm:$0xff]  }
  0x47   :  { %1629 = vmatprep.subr.bf16.mxu1 %v3277_v57  ;;  %v3370_v57 = vld [vmem:[#allocation2 + $0x28c] ss:$16 sps:$4 sm:$0xff]  }
  0x49   :  { %1482 = vmatpush1.bf16.msra.mxu0 %v3278_v59  ;;  %v3368_v59 = vld [vmem:[#allocation2 + $0x288] ss:$16 sps:$4 sm:$0xff]  }
  0x4a   :  { %1630 = vmatpush1.bf16.msra.mxu1 %v3275_v58  ;;  %1483 = vmatprep.subr.bf16.mxu0 %v3279_v60  ;;  %v3365_v58 = vld [vmem:[#allocation2 + $0x380] ss:$16 sps:$4 sm:$0xff]   ;;  %v3373_v60 = vld [vmem:[#allocation2 + $0x3a4] ss:$16 sps:$4 sm:$0xff]  }
  0x4b   :  { %1631 = vmatprep.subr.bf16.mxu1 %v3283_v61  ;;  %v3376_v61 = vld [vmem:[#allocation2 + $0x2ac] ss:$16 sps:$4 sm:$0xff]  }
  0x4d   :  { %1484 = vmatpush1.bf16.msra.mxu0 %v3284_v63  ;;  %v3374_v63 = vld [vmem:[#allocation2 + $0x2a8] ss:$16 sps:$4 sm:$0xff]  }
  0x4e   :  { %1632 = vmatpush1.bf16.msra.mxu1 %v3281_v62  ;;  %1485 = vmatprep.subr.bf16.mxu0 %v3285_v1  ;;  %v3371_v62 = vld [vmem:[#allocation2 + $0x3a0] ss:$16 sps:$4 sm:$0xff]   ;;  %v3379_v1 = vld [vmem:[#allocation2 + $0x3c4] ss:$16 sps:$4 sm:$0xff]  }
  0x4f   :  { %1633 = vmatprep.subr.bf16.mxu1 %v3289_v2  ;;  %v3382_v2 = vld [vmem:[#allocation2 + $0x2cc] ss:$16 sps:$4 sm:$0xff]  }
  0x51   :  { %1486 = vmatpush1.bf16.msra.mxu0 %v3290_v4  ;;  %v3380_v4 = vld [vmem:[#allocation2 + $0x2c8] ss:$16 sps:$4 sm:$0xff]  }
  0x52   :  { %1634 = vmatpush1.bf16.msra.mxu1 %v3287_v3  ;;  %1496 = vmatprep.subr.bf16.mxu0 %v3295_v5  ;;  %v3377_v3 = vld [vmem:[#allocation2 + $0x3c0] ss:$16 sps:$4 sm:$0xff]   ;;  %v3385_v5 = vld [vmem:[#allocation2 + $0x3e4] ss:$16 sps:$4 sm:$0xff]  }
  0x53   :  { %1635 = vmatprep.subr.bf16.mxu1 %v3298_v6  ;;  %v3388_v6 = vld [vmem:[#allocation2 + $0x2ec] ss:$16 sps:$4 sm:$0xff]  }
  0x54   :  { %1488 = vmatmul.mubr.bf16.vlgmr.msra.gmra.mrb[0].mxu0 %v3812_v7 }
  0x55   :  { %1497 = vmatpush1.bf16.msra.mxu0 %v3293_v8  ;;  %1528 = vmatprep.mubr.bf16.mxu0 %v2748_v35  ;;  %v3386_v8 = vld [vmem:[#allocation2 + $0x2e8] ss:$16 sps:$4 sm:$0xff]  }
  0x56   :  { %1636 = vmatpush1.bf16.msra.mxu1 %v3296_v9  ;;  %1498 = vmatprep.subr.bf16.mxu0 %v3301_v10  ;;  %v3393_v9 = vld [vmem:[#allocation2 + $0x404] ss:$16 sps:$4 sm:$0xff]   ;;  %v3396_v10 = vld [vmem:[#allocation2 + $0x30c] ss:$16 sps:$4 sm:$0xff]  }
  0x57   :  { %1637 = vmatprep.subr.bf16.mxu1 %v3304_v11  ;;  %v3825_v11 = vcombine.low %v3818_v32, %v3818_v32  ;;  %v3423_v32 = vld [vmem:[#allocation2 + $0x4a4] ss:$16 sps:$4 sm:$0xff]  }
  0x59   :  { %1499 = vmatpush1.bf16.msra.mxu0 %v3299_v12  ;;  %v3391_v12 = vld [vmem:[#allocation2 + $0x400] ss:$16 sps:$4 sm:$0xff]  }
  0x5a   :  { %1638 = vmatpush1.bf16.msra.mxu1 %v3302_v13  ;;  %1500 = vmatprep.subr.bf16.mxu0 %v3307_v14  ;;  %v3394_v13 = vld [vmem:[#allocation2 + $0x308] ss:$16 sps:$4 sm:$0xff]   ;;  %v3399_v14 = vld [vmem:[#allocation2 + $0x424] ss:$16 sps:$4 sm:$0xff]  }
  0x5b   :  { %1639 = vmatprep.subr.bf16.mxu1 %v3310_v15  ;;  %v3402_v15 = vld [vmem:[#allocation2 + $0x32c] ss:$16 sps:$4 sm:$0xff]  }
  0x5d   :  { %1501 = vmatpush1.bf16.msra.mxu0 %v3305_v16  ;;  %v3830_v16 = vld [vmem:[%s4204_s0 + $0x10] sm:$0xff] }
  0x5e   :  { %1640 = vmatpush1.bf16.msra.mxu1 %v3308_v17  ;;  %1502 = vmatprep.subr.bf16.mxu0 %v3313_v18  ;;  %v3834_v17 = vcombine.high %v3830_v16, %v3830_v16  ;;  %v3397_v18 = vld [vmem:[#allocation2 + $0x420] ss:$16 sps:$4 sm:$0xff]  }
  0x5f   :  { %1641 = vmatprep.subr.bf16.mxu1 %v3316_v19  ;;  %v3400_v19 = vld [vmem:[#allocation2 + $0x328] ss:$16 sps:$4 sm:$0xff]  }
  0x61   :  { %1503 = vmatpush1.bf16.msra.mxu0 %v3311_v20  ;;  %v3405_v20 = vld [vmem:[#allocation2 + $0x444] ss:$16 sps:$4 sm:$0xff]  }
  0x62   :  { %1642 = vmatpush1.bf16.msra.mxu1 %v3314_v21  ;;  %1504 = vmatprep.subr.bf16.mxu0 %v3319_v22  ;;  %v3408_v21 = vld [vmem:[#allocation2 + $0x34c] ss:$16 sps:$4 sm:$0xff]   ;;  %v3403_v22 = vld [vmem:[#allocation2 + $0x440] ss:$16 sps:$4 sm:$0xff]  }
  0x63   :  { %1643 = vmatprep.subr.bf16.mxu1 %v3322_v23  ;;  %v3406_v23 = vld [vmem:[#allocation2 + $0x348] ss:$16 sps:$4 sm:$0xff]  }
  0x65   :  { %1505 = vmatpush1.bf16.msra.mxu0 %v3317_v24  ;;  %v3411_v24 = vld [vmem:[#allocation2 + $0x464] ss:$16 sps:$4 sm:$0xff]  }
  0x66   :  { %1644 = vmatpush1.bf16.msra.mxu1 %v3320_v25  ;;  %1506 = vmatprep.subr.bf16.mxu0 %v3325_v26  ;;  %v3414_v25 = vld [vmem:[#allocation2 + $0x36c] ss:$16 sps:$4 sm:$0xff]   ;;  %v3409_v26 = vld [vmem:[#allocation2 + $0x460] ss:$16 sps:$4 sm:$0xff]  }
  0x67   :  { %1645 = vmatprep.subr.bf16.mxu1 %v3328_v27  ;;  %v3412_v27 = vld [vmem:[#allocation2 + $0x368] ss:$16 sps:$4 sm:$0xff]  }
  0x69   :  { %1507 = vmatpush1.bf16.msra.mxu0 %v3323_v28  ;;  %v3417_v28 = vld [vmem:[#allocation2 + $0x484] ss:$16 sps:$4 sm:$0xff]  }
  0x6a   :  { %1646 = vmatpush1.bf16.msra.mxu1 %v3326_v29  ;;  %1508 = vmatprep.subr.bf16.mxu0 %v3331_v30  ;;  %v3420_v29 = vld [vmem:[#allocation2 + $0x38c] ss:$16 sps:$4 sm:$0xff]   ;;  %v3415_v30 = vld [vmem:[#allocation2 + $0x480] ss:$16 sps:$4 sm:$0xff]  }
  0x6b   :  { %1647 = vmatprep.subr.bf16.mxu1 %v3334_v31  ;;  %v3418_v31 = vld [vmem:[#allocation2 + $0x388] ss:$16 sps:$4 sm:$0xff]  }
  0x6d   :  { %1509 = vmatpush1.bf16.msra.mxu0 %v3329_v33  ;;  %v3426_v33 = vld [vmem:[#allocation2 + $0x3ac] ss:$16 sps:$4 sm:$0xff]  }
  0x6e   :  { %1648 = vmatpush1.bf16.msra.mxu1 %v3332_v34  ;;  %1510 = vmatprep.subr.bf16.mxu0 %v3337_v36  ;;  %v3421_v34 = vld [vmem:[#allocation2 + $0x4a0] ss:$16 sps:$4 sm:$0xff]   ;;  %v3429_v36 = vld [vmem:[#allocation2 + $0x4c4] ss:$16 sps:$4 sm:$0xff]  }
  0x6f   :  { %1649 = vmatprep.subr.bf16.mxu1 %v3340_v37  ;;  %v3432_v37 = vld [vmem:[#allocation2 + $0x3cc] ss:$16 sps:$4 sm:$0xff]  }
  0x71   :  { %1511 = vmatpush1.bf16.msra.mxu0 %v3335_v38  ;;  %v3427_v38 = vld [vmem:[#allocation2 + $0x4c0] ss:$16 sps:$4 sm:$0xff]  }
  0x72   :  { %1650 = vmatpush1.bf16.msra.mxu1 %v3338_v39  ;;  %1512 = vmatprep.subr.bf16.mxu0 %v3343_v40  ;;  %v3430_v39 = vld [vmem:[#allocation2 + $0x3c8] ss:$16 sps:$4 sm:$0xff]   ;;  %v3435_v40 = vld [vmem:[#allocation2 + $0x4e4] ss:$16 sps:$4 sm:$0xff]  }
  0x73   :  { %1660 = vmatprep.subr.bf16.mxu1 %v3346_v41  ;;  %v3438_v41 = vld [vmem:[#allocation2 + $0x3ec] ss:$16 sps:$4 sm:$0xff]  }
  0x75   :  { %1652 = vmatmul.mubr.bf16.vlgmr.msra.gmra.mrb[4].mxu1 %v3812_v7  ;;  %1513 = vmatpush1.bf16.msra.mxu0 %v3341_v42  ;;  %v3383_v7 = vld [vmem:[#allocation2 + $0x3e0] ss:$16 sps:$4 sm:$0xff]  }
  0x76   :  { %1661 = vmatpush1.bf16.msra.mxu1 %v3344_v43  ;;  %1514 = vmatprep.subr.bf16.mxu0 %v3349_v44  ;;  %v3433_v42 = vld [vmem:[#allocation2 + $0x4e0] ss:$16 sps:$4 sm:$0xff]   ;;  %v3436_v43 = vld [vmem:[#allocation2 + $0x3e8] ss:$16 sps:$4 sm:$0xff]   ;;  %v3441_v44 = vld [vmem:[#allocation2 + $0x504] ss:$16 sps:$4 sm:$0xff]  }
  0x77   :  { %1662 = vmatprep.subr.bf16.mxu1 %v3352_v45  ;;  %1692 = vmatprep.mubr.bf16.mxu1 %v2748_v35  ;;  %v3424_v35 = vld [vmem:[#allocation2 + $0x3a8] ss:$16 sps:$4 sm:$0xff]   ;;  %v3444_v45 = vld [vmem:[#allocation2 + $0x40c] ss:$16 sps:$4 sm:$0xff]  }
  0x79   :  { %1515 = vmatpush1.bf16.msra.mxu0 %v3347_v46  ;;  %v3439_v46 = vld [vmem:[#allocation2 + $0x500] ss:$16 sps:$4 sm:$0xff]  }
  0x7a   :  { %1663 = vmatpush1.bf16.msra.mxu1 %v3350_v47  ;;  %1516 = vmatprep.subr.bf16.mxu0 %v3355_v48  ;;  %v3442_v47 = vld [vmem:[#allocation2 + $0x408] ss:$16 sps:$4 sm:$0xff]   ;;  %v3447_v48 = vld [vmem:[#allocation2 + $0x524] ss:$16 sps:$4 sm:$0xff]  }
  0x7b   :  { %1664 = vmatprep.subr.bf16.mxu1 %v3358_v49  ;;  %v3450_v49 = vld [vmem:[#allocation2 + $0x42c] ss:$16 sps:$4 sm:$0xff]  }
  0x7d   :  { %1517 = vmatpush1.bf16.msra.mxu0 %v3353_v50  ;;  %v3445_v50 = vld [vmem:[#allocation2 + $0x520] ss:$16 sps:$4 sm:$0xff]  }
  0x7e   :  { %1665 = vmatpush1.bf16.msra.mxu1 %v3356_v51  ;;  %1518 = vmatprep.subr.bf16.mxu0 %v3361_v52  ;;  %v3448_v51 = vld [vmem:[#allocation2 + $0x428] ss:$16 sps:$4 sm:$0xff]   ;;  %v3453_v52 = vld [vmem:[#allocation2 + $0x544] ss:$16 sps:$4 sm:$0xff]  }
  0x7f   :  { %1666 = vmatprep.subr.bf16.mxu1 %v3364_v53  ;;  %v3456_v53 = vld [vmem:[#allocation2 + $0x44c] ss:$16 sps:$4 sm:$0xff]  }
  0x81   :  { %1519 = vmatpush1.bf16.msra.mxu0 %v3359_v54  ;;  %v3451_v54 = vld [vmem:[#allocation2 + $0x540] ss:$16 sps:$4 sm:$0xff]  }
  0x82   :  { %1667 = vmatpush1.bf16.msra.mxu1 %v3362_v55  ;;  %1520 = vmatprep.subr.bf16.mxu0 %v3367_v56  ;;  %v3454_v55 = vld [vmem:[#allocation2 + $0x448] ss:$16 sps:$4 sm:$0xff]   ;;  %v3459_v56 = vld [vmem:[#allocation2 + $0x564] ss:$16 sps:$4 sm:$0xff]  }
  0x83   :  { %1668 = vmatprep.subr.bf16.mxu1 %v3370_v57  ;;  %v3462_v57 = vld [vmem:[#allocation2 + $0x46c] ss:$16 sps:$4 sm:$0xff]  }
  0x85   :  { %1521 = vmatpush1.bf16.msra.mxu0 %v3365_v58  ;;  %v3457_v58 = vld [vmem:[#allocation2 + $0x560] ss:$16 sps:$4 sm:$0xff]  }
  0x86   :  { %1669 = vmatpush1.bf16.msra.mxu1 %v3368_v59  ;;  %1522 = vmatprep.subr.bf16.mxu0 %v3373_v60  ;;  %v3460_v59 = vld [vmem:[#allocation2 + $0x468] ss:$16 sps:$4 sm:$0xff]   ;;  %v3465_v60 = vld [vmem:[#allocation2 + $0x584] ss:$16 sps:$4 sm:$0xff]  }
  0x87   :  { %1670 = vmatprep.subr.bf16.mxu1 %v3376_v61  ;;  %v3468_v61 = vld [vmem:[#allocation2 + $0x48c] ss:$16 sps:$4 sm:$0xff]  }
  0x89   :  { %1523 = vmatpush1.bf16.msra.mxu0 %v3371_v62  ;;  %v3463_v62 = vld [vmem:[#allocation2 + $0x580] ss:$16 sps:$4 sm:$0xff]  }
  0x8a   :  { %1671 = vmatpush1.bf16.msra.mxu1 %v3374_v63  ;;  %1524 = vmatprep.subr.bf16.mxu0 %v3379_v1  ;;  %v3466_v63 = vld [vmem:[#allocation2 + $0x488] ss:$16 sps:$4 sm:$0xff]   ;;  %v3471_v1 = vld [vmem:[#allocation2 + $0x5a4] ss:$16 sps:$4 sm:$0xff]  }
  0x8b   :  { %1672 = vmatprep.subr.bf16.mxu1 %v3382_v2  ;;  %v3474_v2 = vld [vmem:[#allocation2 + $0x4ac] ss:$16 sps:$4 sm:$0xff]  }
  0x8d   :  { %1525 = vmatpush1.bf16.msra.mxu0 %v3377_v3  ;;  %v3469_v3 = vld [vmem:[#allocation2 + $0x5a0] ss:$16 sps:$4 sm:$0xff]  }
  0x8e   :  { %1673 = vmatpush1.bf16.msra.mxu1 %v3380_v4  ;;  %1526 = vmatprep.subr.bf16.mxu0 %v3385_v5  ;;  %v3472_v4 = vld [vmem:[#allocation2 + $0x4a8] ss:$16 sps:$4 sm:$0xff]   ;;  %v3477_v5 = vld [vmem:[#allocation2 + $0x5c4] ss:$16 sps:$4 sm:$0xff]  }
  0x8f   :  { %1674 = vmatprep.subr.bf16.mxu1 %v3388_v6  ;;  %v3480_v6 = vld [vmem:[#allocation2 + $0x4cc] ss:$16 sps:$4 sm:$0xff]  }
  0x91   :  { %1527 = vmatpush1.bf16.msra.mxu0 %v3383_v7  ;;  %v3475_v7 = vld [vmem:[#allocation2 + $0x5c0] ss:$16 sps:$4 sm:$0xff]  }
  0x92   :  { %1675 = vmatpush1.bf16.msra.mxu1 %v3386_v8  ;;  %1537 = vmatprep.subr.bf16.mxu0 %v3393_v9  ;;  %v3478_v8 = vld [vmem:[#allocation2 + $0x4c8] ss:$16 sps:$4 sm:$0xff]   ;;  %v3483_v9 = vld [vmem:[#allocation2 + $0x5e4] ss:$16 sps:$4 sm:$0xff]  }
  0x93   :  { %1676 = vmatprep.subr.bf16.mxu1 %v3396_v10  ;;  %v3486_v10 = vld [vmem:[#allocation2 + $0x4ec] ss:$16 sps:$4 sm:$0xff]  }
  0x94   :  { %1529 = vmatmul.mubr.bf16.vlgmr.msra.gmra.mrb[0].mxu0 %v3825_v11 }
  0x95   :  { %1538 = vmatpush1.bf16.msra.mxu0 %v3391_v12  ;;  %1569 = vmatprep.mubr.bf16.mxu0 %v3834_v17  ;;  %v3484_v12 = vld [vmem:[#allocation2 + $0x4e8] ss:$16 sps:$4 sm:$0xff]  }
  0x96   :  { %1677 = vmatpush1.bf16.msra.mxu1 %v3394_v13  ;;  %1539 = vmatprep.subr.bf16.mxu0 %v3399_v14  ;;  %v3491_v13 = vld [vmem:[#allocation2 + $0x50c] ss:$16 sps:$4 sm:$0xff]  }
  0x97   :  { %1678 = vmatprep.subr.bf16.mxu1 %v3402_v15  ;;  %v3539_v14 = vld [vmem:[%s4207_s3 + $0x4] ss:$8 sps:$4 sm:$0xff]   ;;  %v3489_v15 = vld [vmem:[#allocation2 + $0x508] ss:$16 sps:$4 sm:$0xff]  }
  0x99   :  { %1540 = vmatpush1.bf16.msra.mxu0 %v3397_v18  ;;  %v3848_v18 = vcombine.low %v3830_v16, %v3830_v16  ;;  %v3545_v16 = vld [vmem:[%s4207_s3 + $0x24] ss:$8 sps:$4 sm:$0xff]  }
  0x9a   :  { %1679 = vmatpush1.bf16.msra.mxu1 %v3400_v19  ;;  %1541 = vmatprep.subr.bf16.mxu0 %v3405_v20  ;;  %v3494_v19 = vld [vmem:[#allocation2 + $0x52c] ss:$16 sps:$4 sm:$0xff]  }
  0x9b   :  { %1680 = vmatprep.subr.bf16.mxu1 %v3408_v21  ;;  %v3542_v20 = vld [vmem:[%s4207_s3 + $0x14] ss:$8 sps:$4 sm:$0xff]   ;;  %v3492_v21 = vld [vmem:[#allocation2 + $0x528] ss:$16 sps:$4 sm:$0xff]  }
  0x9d   :  { %1542 = vmatpush1.bf16.msra.mxu0 %v3403_v22  ;;  %v3540_v22 = vld [vmem:[%s4207_s3 + $0x10] ss:$8 sps:$4 sm:$0xff]  }
  0x9e   :  { %1681 = vmatpush1.bf16.msra.mxu1 %v3406_v23  ;;  %1543 = vmatprep.subr.bf16.mxu0 %v3411_v24  ;;  %v3497_v23 = vld [vmem:[#allocation2 + $0x54c] ss:$16 sps:$4 sm:$0xff]   ;;  %v3495_v24 = vld [vmem:[#allocation2 + $0x548] ss:$16 sps:$4 sm:$0xff]  }
  0x9f   :  { %1682 = vmatprep.subr.bf16.mxu1 %v3414_v25  ;;  %v3543_v25 = vld [vmem:[%s4207_s3 + $0x20] ss:$8 sps:$4 sm:$0xff]  }
  0xa1   :  { %1544 = vmatpush1.bf16.msra.mxu0 %v3409_v26  ;;  %v3500_v26 = vld [vmem:[#allocation2 + $0x56c] ss:$16 sps:$4 sm:$0xff]  }
  0xa2   :  { %1683 = vmatpush1.bf16.msra.mxu1 %v3412_v27  ;;  %1545 = vmatprep.subr.bf16.mxu0 %v3417_v28  ;;  %v3548_v27 = vld [vmem:[%s4207_s3 + $0x34] ss:$8 sps:$4 sm:$0xff]   ;;  %v3498_v28 = vld [vmem:[#allocation2 + $0x568] ss:$16 sps:$4 sm:$0xff]  }
  0xa3   :  { %1684 = vmatprep.subr.bf16.mxu1 %v3420_v29  ;;  %v3546_v29 = vld [vmem:[%s4207_s3 + $0x30] ss:$8 sps:$4 sm:$0xff]  }
  0xa5   :  { %1546 = vmatpush1.bf16.msra.mxu0 %v3415_v30  ;;  %v3503_v30 = vld [vmem:[#allocation2 + $0x58c] ss:$16 sps:$4 sm:$0xff]  }
  0xa6   :  { %1685 = vmatpush1.bf16.msra.mxu1 %v3418_v31  ;;  %1547 = vmatprep.subr.bf16.mxu0 %v3423_v32  ;;  %v3551_v31 = vld [vmem:[%s4207_s3 + $0x44] ss:$8 sps:$4 sm:$0xff]   ;;  %v3501_v32 = vld [vmem:[#allocation2 + $0x588] ss:$16 sps:$4 sm:$0xff]  }
  0xa7   :  { %1686 = vmatprep.subr.bf16.mxu1 %v3426_v33  ;;  %v3549_v33 = vld [vmem:[%s4207_s3 + $0x40] ss:$8 sps:$4 sm:$0xff]  }
  0xa9   :  { %1548 = vmatpush1.bf16.msra.mxu0 %v3421_v34  ;;  %v3506_v34 = vld [vmem:[#allocation2 + $0x5ac] ss:$16 sps:$4 sm:$0xff]  }
  0xaa   :  { %1687 = vmatpush1.bf16.msra.mxu1 %v3424_v35  ;;  %1549 = vmatprep.subr.bf16.mxu0 %v3429_v36  ;;  %v3554_v35 = vld [vmem:[%s4207_s3 + $0x54] ss:$8 sps:$4 sm:$0xff]   ;;  %v3504_v36 = vld [vmem:[#allocation2 + $0x5a8] ss:$16 sps:$4 sm:$0xff]  }
  0xab   :  { %1688 = vmatprep.subr.bf16.mxu1 %v3432_v37  ;;  %v3552_v37 = vld [vmem:[%s4207_s3 + $0x50] ss:$8 sps:$4 sm:$0xff]  }
  0xad   :  { %1550 = vmatpush1.bf16.msra.mxu0 %v3427_v38  ;;  %v3509_v38 = vld [vmem:[#allocation2 + $0x5cc] ss:$16 sps:$4 sm:$0xff]  }
  0xae   :  { %1689 = vmatpush1.bf16.msra.mxu1 %v3430_v39  ;;  %1551 = vmatprep.subr.bf16.mxu0 %v3435_v40  ;;  %v3557_v39 = vld [vmem:[%s4207_s3 + $0x64] ss:$8 sps:$4 sm:$0xff]   ;;  %v3507_v40 = vld [vmem:[#allocation2 + $0x5c8] ss:$16 sps:$4 sm:$0xff]  }
  0xaf   :  { %1690 = vmatprep.subr.bf16.mxu1 %v3438_v41  ;;  %v3555_v41 = vld [vmem:[%s4207_s3 + $0x60] ss:$8 sps:$4 sm:$0xff]  }
  0xb1   :  { %1552 = vmatpush1.bf16.msra.mxu0 %v3433_v42  ;;  %v3512_v42 = vld [vmem:[#allocation2 + $0x5ec] ss:$16 sps:$4 sm:$0xff]  }
  0xb2   :  { %1691 = vmatpush1.bf16.msra.mxu1 %v3436_v43  ;;  %1553 = vmatprep.subr.bf16.mxu0 %v3441_v44  ;;  %v3560_v43 = vld [vmem:[%s4207_s3 + $0x74] ss:$8 sps:$4 sm:$0xff]   ;;  %v3510_v44 = vld [vmem:[#allocation2 + $0x5e8] ss:$16 sps:$4 sm:$0xff]  }
  0xb3   :  { %1701 = vmatprep.subr.bf16.mxu1 %v3444_v45  ;;  %v3558_v45 = vld [vmem:[%s4207_s3 + $0x70] ss:$8 sps:$4 sm:$0xff]  }
  0xb5   :  { %1693 = vmatmul.mubr.bf16.vlgmr.msra.gmra.mrb[4].mxu1 %v3825_v11  ;;  %1554 = vmatpush1.bf16.msra.mxu0 %v3439_v46  ;;  %v3481_v11 = vld [vmem:[#allocation2 + $0x5e0] ss:$16 sps:$4 sm:$0xff]   ;;  %v3515_v46 = vld [vmem:[#allocation2 + $0x60c] ss:$16 sps:$4 sm:$0xff]  }
  0xb6   :  { %1702 = vmatpush1.bf16.msra.mxu1 %v3442_v47  ;;  %1555 = vmatprep.subr.bf16.mxu0 %v3447_v48  ;;  %v3563_v47 = vld [vmem:[%s4207_s3 + $0x84] ss:$8 sps:$4 sm:$0xff]   ;;  %v3513_v48 = vld [vmem:[#allocation2 + $0x608] ss:$16 sps:$4 sm:$0xff]  }
  0xb7   :  { %1703 = vmatprep.subr.bf16.mxu1 %v3450_v49  ;;  %1733 = vmatprep.mubr.bf16.mxu1 %v3834_v17  ;;  %v3537_v17 = vld [vmem:[%s4207_s3] ss:$8 sps:$4 sm:$0xff]   ;;  %v3518_v49 = vld [vmem:[#allocation2 + $0x62c] ss:$16 sps:$4 sm:$0xff]  }
  0xb9   :  { %1556 = vmatpush1.bf16.msra.mxu0 %v3445_v50  ;;  %v3561_v50 = vld [vmem:[%s4207_s3 + $0x80] ss:$8 sps:$4 sm:$0xff]  }
  0xba   :  { %1704 = vmatpush1.bf16.msra.mxu1 %v3448_v51  ;;  %1557 = vmatprep.subr.bf16.mxu0 %v3453_v52  ;;  %v3566_v51 = vld [vmem:[%s4207_s3 + $0x94] ss:$8 sps:$4 sm:$0xff]   ;;  %v3516_v52 = vld [vmem:[#allocation2 + $0x628] ss:$16 sps:$4 sm:$0xff]  }
  0xbb   :  { %1705 = vmatprep.subr.bf16.mxu1 %v3456_v53  ;;  %v3521_v53 = vld [vmem:[#allocation2 + $0x64c] ss:$16 sps:$4 sm:$0xff]  }
  0xbd   :  { %1558 = vmatpush1.bf16.msra.mxu0 %v3451_v54  ;;  %v3564_v54 = vld [vmem:[%s4207_s3 + $0x90] ss:$8 sps:$4 sm:$0xff]  }
  0xbe   :  { %1706 = vmatpush1.bf16.msra.mxu1 %v3454_v55  ;;  %1559 = vmatprep.subr.bf16.mxu0 %v3459_v56  ;;  %v3569_v55 = vld [vmem:[%s4207_s3 + $0xa4] ss:$8 sps:$4 sm:$0xff]   ;;  %v3519_v56 = vld [vmem:[#allocation2 + $0x648] ss:$16 sps:$4 sm:$0xff]  }
  0xbf   :  { %1707 = vmatprep.subr.bf16.mxu1 %v3462_v57  ;;  %v3524_v57 = vld [vmem:[#allocation2 + $0x66c] ss:$16 sps:$4 sm:$0xff]  }
  0xc1   :  { %1560 = vmatpush1.bf16.msra.mxu0 %v3457_v58  ;;  %v3572_v58 = vld [vmem:[%s4207_s3 + $0xb4] ss:$8 sps:$4 sm:$0xff]  }
  0xc2   :  { %1708 = vmatpush1.bf16.msra.mxu1 %v3460_v59  ;;  %1561 = vmatprep.subr.bf16.mxu0 %v3465_v60  ;;  %v3522_v59 = vld [vmem:[#allocation2 + $0x668] ss:$16 sps:$4 sm:$0xff]   ;;  %v3527_v60 = vld [vmem:[#allocation2 + $0x68c] ss:$16 sps:$4 sm:$0xff]  }
  0xc3   :  { %1709 = vmatprep.subr.bf16.mxu1 %v3468_v61  ;;  %v3570_v61 = vld [vmem:[%s4207_s3 + $0xb0] ss:$8 sps:$4 sm:$0xff]  }
  0xc5   :  { %1562 = vmatpush1.bf16.msra.mxu0 %v3463_v62  ;;  %v3575_v62 = vld [vmem:[%s4207_s3 + $0xc4] ss:$8 sps:$4 sm:$0xff]  }
  0xc6   :  { %1710 = vmatpush1.bf16.msra.mxu1 %v3466_v63  ;;  %1563 = vmatprep.subr.bf16.mxu0 %v3471_v1  ;;  %v3525_v63 = vld [vmem:[#allocation2 + $0x688] ss:$16 sps:$4 sm:$0xff]   ;;  %v3530_v1 = vld [vmem:[#allocation2 + $0x6ac] ss:$16 sps:$4 sm:$0xff]  }
  0xc7   :  { %1711 = vmatprep.subr.bf16.mxu1 %v3474_v2  ;;  %v3573_v2 = vld [vmem:[%s4207_s3 + $0xc0] ss:$8 sps:$4 sm:$0xff]  }
  0xc9   :  { %1564 = vmatpush1.bf16.msra.mxu0 %v3469_v3  ;;  %v3578_v3 = vld [vmem:[%s4207_s3 + $0xd4] ss:$8 sps:$4 sm:$0xff]  }
  0xca   :  { %1712 = vmatpush1.bf16.msra.mxu1 %v3472_v4  ;;  %1565 = vmatprep.subr.bf16.mxu0 %v3477_v5  ;;  %v3528_v4 = vld [vmem:[#allocation2 + $0x6a8] ss:$16 sps:$4 sm:$0xff]   ;;  %v3533_v5 = vld [vmem:[#allocation2 + $0x6cc] ss:$16 sps:$4 sm:$0xff]  }
  0xcb   :  { %1713 = vmatprep.subr.bf16.mxu1 %v3480_v6  ;;  %v3576_v6 = vld [vmem:[%s4207_s3 + $0xd0] ss:$8 sps:$4 sm:$0xff]  }
  0xcd   :  { %1566 = vmatpush1.bf16.msra.mxu0 %v3475_v7 }
  0xce   :  { %1714 = vmatpush1.bf16.msra.mxu1 %v3478_v8  ;;  %1567 = vmatprep.subr.bf16.mxu0 %v3483_v9 }
  0xcf   :  { %1715 = vmatprep.subr.bf16.mxu1 %v3486_v10  ;;  %v3531_v10 = vld [vmem:[#allocation2 + $0x6c8] ss:$16 sps:$4 sm:$0xff]  }
  0xd1   :  { %1568 = vmatpush1.bf16.msra.mxu0 %v3481_v11 }
  0xd2   :  { %1716 = vmatpush1.bf16.msra.mxu1 %v3484_v12  ;;  %2187 = vmatprep.subr.bf16.mxu0 %v3539_v14  ;;  %v3536_v12 = vld [vmem:[#allocation2 + $0x6ec] ss:$16 sps:$4 sm:$0xff]   ;;  %v3667_v14 = vld [vmem:[%s4204_s0 + $0x18] ss:$0 sps:$4 sm:$0xff]  }
  0xd3   :  { %1717 = vmatprep.subr.bf16.mxu1 %v3491_v13  ;;  %v3534_v13 = vld [vmem:[#allocation2 + $0x6e8] ss:$16 sps:$4 sm:$0xff]  }
  0xd4   :  { %1570 = vmatmul.mubr.bf16.vlgmr.msra.gmra.mrb[0].mxu0 %v3848_v18 }
  0xd5   :  { %2188 = vmatpush1.bf16.msra.mxu0 %v3537_v17  ;;  %v3579_v17 = vld [vmem:[%s4207_s3 + $0xe0] ss:$8 sps:$4 sm:$0xff]  }
  0xd6   :  { %1718 = vmatpush1.bf16.msra.mxu1 %v3489_v15  ;;  %2189 = vmatprep.subr.bf16.mxu0 %v3542_v20  ;;  %v3581_v15 = vld [vmem:[%s4207_s3 + $0xe4] ss:$8 sps:$4 sm:$0xff]  }
  0xd7   :  { %1719 = vmatprep.subr.bf16.mxu1 %v3494_v19  ;;  %v3582_v19 = vld [vmem:[%s4207_s3 + $0xf0] ss:$8 sps:$4 sm:$0xff]   ;;  %v3587_v20 = vld [vmem:[%s4207_s3 + $0x104] ss:$8 sps:$4 sm:$0xff]  }
  0xd9   :  { %2190 = vmatpush1.bf16.msra.mxu0 %v3540_v22  ;;  %v3634_v22 = vld [vmem:[%s4209_s5] sm:$0xff]  }
  0xda   :  { %1720 = vmatpush1.bf16.msra.mxu1 %v3492_v21  ;;  %2191 = vmatprep.subr.bf16.mxu0 %v3545_v16  ;;  %v3633_v21 = vld [vmem:[%s4209_s5 + $0x40] sm:$0xff]   ;;  %v3636_v16 = vld [vmem:[%s4209_s5 + $0x8] sm:$0xff]  }
  0xdb   :  { %1721 = vmatprep.subr.bf16.mxu1 %v3497_v23  ;;  %v3635_v23 = vld [vmem:[%s4209_s5 + $0x48] sm:$0xff]  }
  0xdd   :  { %2192 = vmatpush1.bf16.msra.mxu0 %v3543_v25  ;;  %v3638_v25 = vld [vmem:[%s4209_s5 + $0x10] sm:$0xff]  }
  0xde   :  { %1722 = vmatpush1.bf16.msra.mxu1 %v3495_v24  ;;  %2193 = vmatprep.subr.bf16.mxu0 %v3548_v27  ;;  %v3637_v24 = vld [vmem:[%s4209_s5 + $0x50] sm:$0xff]   ;;  %v3640_v27 = vld [vmem:[%s4209_s5 + $0x18] sm:$0xff]  }
  0xdf   :  { %1723 = vmatprep.subr.bf16.mxu1 %v3500_v26  ;;  %v3639_v26 = vld [vmem:[%s4209_s5 + $0x58] sm:$0xff]  }
  0xe1   :  { %2194 = vmatpush1.bf16.msra.mxu0 %v3546_v29  ;;  %v3642_v29 = vld [vmem:[%s4209_s5 + $0x20] sm:$0xff]  }
  0xe2   :  { %1724 = vmatpush1.bf16.msra.mxu1 %v3498_v28  ;;  %2195 = vmatprep.subr.bf16.mxu0 %v3551_v31  ;;  %v3641_v28 = vld [vmem:[%s4209_s5 + $0x60] sm:$0xff]   ;;  %v3644_v31 = vld [vmem:[%s4209_s5 + $0x28] sm:$0xff]  }
  0xe3   :  { %1725 = vmatprep.subr.bf16.mxu1 %v3503_v30  ;;  %v3643_v30 = vld [vmem:[%s4209_s5 + $0x68] sm:$0xff]  }
  0xe5   :  { %2196 = vmatpush1.bf16.msra.mxu0 %v3549_v33 }
  0xe6   :  { %1726 = vmatpush1.bf16.msra.mxu1 %v3501_v32  ;;  %2197 = vmatprep.subr.bf16.mxu0 %v3554_v35  ;;  %v290_v32 = vlaneseq  ;;  %v3992_v35 = vld [vmem:[%s4206_s2] sm:$0xf] }
  0xe7   :  { %1727 = vmatprep.subr.bf16.mxu1 %v3506_v34 }
  0xe8   :  { %v3986_v33 = vshrl.u32 %v290_v32, 7 }
  0xe9   :  { %2198 = vmatpush1.bf16.msra.mxu0 %v3552_v37 }
  0xea   :  { %1728 = vmatpush1.bf16.msra.mxu1 %v3504_v36  ;;  %2199 = vmatprep.subr.bf16.mxu0 %v3557_v39  ;;  %v292_v34 = vsub.s32 0, %v3986_v33  ;;  %v296_v36 = vsub.s32 1, %v3986_v33 }
  0xeb   :  { %1729 = vmatprep.subr.bf16.mxu1 %v3509_v38 }
  0xec   :  { %v293_v37 = vrot.slane %v3992_v35, %v292_v34  ;;  %v297_v38 = vrot.slane %v3992_v35, %v296_v36 }
  0xed   :  { %2200 = vmatpush1.bf16.msra.mxu0 %v3555_v41 }
  0xee   :  { %1730 = vmatpush1.bf16.msra.mxu1 %v3507_v40  ;;  %2201 = vmatprep.subr.bf16.mxu0 %v3560_v43 }
  0xef   :  { %1731 = vmatprep.subr.bf16.mxu1 %v3512_v42 }
  0xf1   :  { %2202 = vmatpush1.bf16.msra.mxu0 %v3558_v45 }
  0xf2   :  { %1732 = vmatpush1.bf16.msra.mxu1 %v3510_v44  ;;  %2203 = vmatprep.subr.bf16.mxu0 %v3563_v47 }
  0xf3   :  { %1742 = vmatprep.subr.bf16.mxu1 %v3515_v46 }
  0xf5   :  { %1734 = vmatmul.mubr.bf16.vlgmr.msra.gmra.mrb[4].mxu1 %v3848_v18  ;;  %2204 = vmatpush1.bf16.msra.mxu0 %v3561_v50  ;;  %v3584_v18 = vld [vmem:[%s4207_s3 + $0xf4] ss:$8 sps:$4 sm:$0xff]   ;;  %v3585_v50 = vld [vmem:[%s4207_s3 + $0x100] ss:$8 sps:$4 sm:$0xff]  }
  0xf6   :  { %1743 = vmatpush1.bf16.msra.mxu1 %v3513_v48  ;;  %1774 = vmatprep.mubr.bf16.mxu1 %v3719_v0  ;;  %v3567_v0 = vld [vmem:[%s4207_s3 + $0xa0] ss:$8 sps:$4 sm:$0xff]  }
  0xf7   :  { %1744 = vmatprep.subr.bf16.mxu1 %v3518_v49  ;;  %2205 = vmatprep.subr.bf16.mxu0 %v3566_v51 }
  0xf9   :  { %2206 = vmatpush1.bf16.msra.mxu0 %v3564_v54  ;;  %v3593_v54 = vld [vmem:[%s4207_s3 + $0x124] ss:$8 sps:$4 sm:$0xff]  }
  0xfa   :  { %1745 = vmatpush1.bf16.msra.mxu1 %v3516_v52  ;;  %2207 = vmatprep.subr.bf16.mxu0 %v3569_v55  ;;  %v3590_v52 = vld [vmem:[%s4207_s3 + $0x114] ss:$8 sps:$4 sm:$0xff]   ;;  %v3591_v55 = vld [vmem:[%s4207_s3 + $0x120] ss:$8 sps:$4 sm:$0xff]  }
  0xfb   :  { %1746 = vmatprep.subr.bf16.mxu1 %v3521_v53  ;;  %v3588_v53 = vld [vmem:[%s4207_s3 + $0x110] ss:$8 sps:$4 sm:$0xff]  }
  0xfd   :  { %2208 = vmatpush1.bf16.msra.mxu0 %v3567_v0  ;;  %v3599_v0 = vld [vmem:[%s4207_s3 + $0x144] ss:$8 sps:$4 sm:$0xff]  }
  0xfe   :  { %1747 = vmatpush1.bf16.msra.mxu1 %v3519_v56  ;;  %2209 = vmatprep.subr.bf16.mxu0 %v3572_v58  ;;  %v3596_v56 = vld [vmem:[%s4207_s3 + $0x134] ss:$8 sps:$4 sm:$0xff]   ;;  %v3597_v58 = vld [vmem:[%s4207_s3 + $0x140] ss:$8 sps:$4 sm:$0xff]  }
  0xff   :  { %1748 = vmatprep.subr.bf16.mxu1 %v3524_v57  ;;  %v3594_v57 = vld [vmem:[%s4207_s3 + $0x130] ss:$8 sps:$4 sm:$0xff]  }
 0x101   :  { %2210 = vmatpush1.bf16.msra.mxu0 %v3570_v61  ;;  %v3605_v61 = vld [vmem:[%s4207_s3 + $0x164] ss:$8 sps:$4 sm:$0xff]  }
 0x102   :  { %1749 = vmatpush1.bf16.msra.mxu1 %v3522_v59  ;;  %2211 = vmatprep.subr.bf16.mxu0 %v3575_v62  ;;  %v3602_v59 = vld [vmem:[%s4207_s3 + $0x154] ss:$8 sps:$4 sm:$0xff]   ;;  %v3603_v62 = vld [vmem:[%s4207_s3 + $0x160] ss:$8 sps:$4 sm:$0xff]  }
 0x103   :  { %1750 = vmatprep.subr.bf16.mxu1 %v3527_v60  ;;  %v3600_v60 = vld [vmem:[%s4207_s3 + $0x150] ss:$8 sps:$4 sm:$0xff]  }
 0x105   :  { %2212 = vmatpush1.bf16.msra.mxu0 %v3573_v2  ;;  %v3611_v2 = vld [vmem:[%s4207_s3 + $0x184] ss:$8 sps:$4 sm:$0xff]  }
 0x106   :  { %1751 = vmatpush1.bf16.msra.mxu1 %v3525_v63  ;;  %2213 = vmatprep.subr.bf16.mxu0 %v3578_v3  ;;  %v3608_v63 = vld [vmem:[%s4207_s3 + $0x174] ss:$8 sps:$4 sm:$0xff]   ;;  %v3609_v3 = vld [vmem:[%s4207_s3 + $0x180] ss:$8 sps:$4 sm:$0xff]  }
 0x107   :  { %1752 = vmatprep.subr.bf16.mxu1 %v3530_v1  ;;  %v3606_v1 = vld [vmem:[%s4207_s3 + $0x170] ss:$8 sps:$4 sm:$0xff]  }
 0x108   :  { %v1612_v7 = vpop.f32.mrb[0].mxu1 }
 0x109   :  { %v1614_v8 = vpop.f32.mrb[1].mxu1  ;;  %2214 = vmatpush1.bf16.msra.mxu0 %v3576_v6  ;;  %v3617_v6 = vld [vmem:[%s4207_s3 + $0x1a4] ss:$8 sps:$4 sm:$0xff]  }
 0x10a   :  { %v1616_v9 = vpop.f32.mrb[2].mxu1  ;;  %1753 = vmatpush1.bf16.msra.mxu1 %v3528_v4  ;;  %2215 = vmatprep.subr.bf16.mxu0 %v3581_v15  ;;  %v3614_v4 = vld [vmem:[%s4207_s3 + $0x194] ss:$8 sps:$4 sm:$0xff]   ;;  %v3624_v15 = vld [vmem:[%s4207_s3 + $0x1d0] ss:$8 sps:$4 sm:$0xff]  }
 0x10b   :  { %v1617_v11 = vpop.f32.mrb[3].mxu1  ;;  %1754 = vmatprep.subr.bf16.mxu1 %v3533_v5  ;;  %v3612_v5 = vld [vmem:[%s4207_s3 + $0x190] ss:$8 sps:$4 sm:$0xff]  }
 0x10c   :  { %v3618_v9 = vld [vmem:[%s4207_s3 + $0x1b0] ss:$8 sps:$4 sm:$0xff]   ;;  %v3621_v11 = vld [vmem:[%s4207_s3 + $0x1c0] ss:$8 sps:$4 sm:$0xff]  }
 0x10d   :  { %2216 = vmatpush1.bf16.msra.mxu0 %v3579_v17 }
 0x10e   :  { %1755 = vmatpush1.bf16.msra.mxu1 %v3531_v10  ;;  %2217 = vmatprep.subr.bf16.mxu0 %v3584_v18  ;;  %v3623_v10 = vld [vmem:[%s4207_s3 + $0x1c4] ss:$8 sps:$4 sm:$0xff]  }
 0x10f   :  { %1756 = vmatprep.subr.bf16.mxu1 %v3536_v12  ;;  %v3626_v12 = vld [vmem:[%s4207_s3 + $0x1d4] ss:$8 sps:$4 sm:$0xff]   ;;  %v3629_v18 = vld [vmem:[%s4207_s3 + $0x1e4] ss:$8 sps:$4 sm:$0xff]  }
 0x111   :  { %2218 = vmatpush1.bf16.msra.mxu0 %v3582_v19 }
 0x112   :  { %1757 = vmatpush1.bf16.msra.mxu1 %v3534_v13  ;;  %2228 = vmatprep.subr.bf16.mxu0 %v3587_v20  ;;  %v300_v13 = vsub.s32 2, %v3986_v33 }
 0x113   :  { %3076 = vmatprep.subr.bf16.mxu1 %v3633_v21  ;;  %v3627_v21 = vld [vmem:[%s4207_s3 + $0x1e0] ss:$8 sps:$4 sm:$0xff]  }
 0x114   :  { %v301_v17 = vrot.slane %v3992_v35, %v300_v13 }
 0x115   :  { %1775 = vmatmul.mubr.bf16.vlgmr.msra.gmra.mrb[4].mxu1 %v3667_v14  ;;  %v304_v14 = vsub.s32 3, %v3986_v33  ;;  %v3650_v33 = vld [vmem:[%s4211_s7 + $0x8] sm:$0xff]  }
 0x116   :  { %3077 = vmatpush3.bf16.msra.mxu1 %v3634_v22 }
 0x117   :  { %3078 = vmatprep.subr.bf16.mxu1 %v3635_v23  ;;  %v305_v19 = vrot.slane %v3992_v35, %v304_v14  ;;  %v3645_v35 = vld [vmem:[%s4209_s5 + $0x70] sm:$0xff]  }
 0x11a   :  { %3079 = vmatpush3.bf16.msra.mxu1 %v3636_v16  ;;  %v3632_v16 = vld [vmem:[%s4207_s3 + $0x1f4] ss:$8 sps:$4 sm:$0xff]  }
 0x11b   :  { %3080 = vmatprep.subr.bf16.mxu1 %v3637_v24 }
 0x11e   :  { %3081 = vmatpush3.bf16.msra.mxu1 %v3638_v25 }
 0x11f   :  { %3082 = vmatprep.subr.bf16.mxu1 %v3639_v26 }
 0x122   :  { %3083 = vmatpush3.bf16.msra.mxu1 %v3640_v27 }
 0x123   :  { %3084 = vmatprep.subr.bf16.mxu1 %v3641_v28  ;;  %v3630_v28 = vld [vmem:[%s4207_s3 + $0x1f0] ss:$8 sps:$4 sm:$0xff]  }
 0x126   :  { %3085 = vmatpush3.bf16.msra.mxu1 %v3642_v29 }
 0x127   :  { %3086 = vmatprep.subr.bf16.mxu1 %v3643_v30 }
 0x12a   :  { %3087 = vmatpush3.bf16.msra.mxu1 %v3644_v31 }
 0x12b   :  { %3088 = vmatprep.subr.bf16.mxu1 %v3645_v35 }
 0x1a7   :  { %v1571_v39 = vpop.f32.mrb[0].mxu0 }
 0x1a8   :  { %v3155_v40 = vadd.f32 %v1571_v39, %v293_v37  ;;  %v1573_v41 = vpop.f32.mrb[1].mxu0  ;;  %v3646_v37 = vld [vmem:[%s4209_s5 + $0x30] sm:$0xff]   ;;  %v3648_v39 = vld [vmem:[%s4209_s5 + $0x38] sm:$0xff]  }
 0x1a9   :  { %v3157_v42 = vadd.f32 %v1573_v41, %v297_v38  ;;  %v1575_v43 = vpop.f32.mrb[2].mxu0  ;;  %3089 = vmatpush3.bf16.msra.mxu1 %v3646_v37  ;;  %v3647_v38 = vld [vmem:[%s4209_s5 + $0x78] sm:$0xff]   ;;  %v1855_v41 = vld [vmem:[%s4208_s4] sm:$0x3] }
 0x1aa   :  { %v3156_v44 = vadd.f32 %v3155_v40, %v1612_v7  ;;  %v1576_v45 = vpop.f32.mrb[3].mxu0  ;;  %v3615_v7 = vld [vmem:[%s4207_s3 + $0x1a0] ss:$8 sps:$4 sm:$0xff]   ;;  %3090 = vmatprep.subr.bf16.mxu1 %v3647_v38  ;;  %v3720_v40 = vmov 0.0   ;;  %v1864_v43 = vrot.slane %v1855_v41, %v296_v36  ;;  %v3652_v36 = vld [vmem:[%s4211_s7 + $0x18] sm:$0xff]  }
 0x1ab   :  { %v3158_v46 = vadd.f32 %v3157_v42, %v1614_v8  ;;  %v3620_v8 = vld [vmem:[%s4207_s3 + $0x1b4] ss:$8 sps:$4 sm:$0xff]   ;;  %v1860_v42 = vrot.slane %v1855_v41, %v292_v34 }
 0x1ac   :  { %v1783_v47 = vmax.f32 %v3156_v44, 0.0  ;;  %v3651_v34 = vld [vmem:[%s4211_s7 + $0x10] sm:$0xff]  }
 0x1ad   :  { %v1784_v48 = vmax.f32 %v3158_v46, 0.0  ;;  %3091 = vmatpush3.bf16.msra.mxu1 %v3648_v39 }
 0x1ae   :  { %v1787_v51 = vpack.c.bf16 %v1783_v47, %v1783_v47  ;;  %3115 = vmatprep.subr.bf16.mxu1 %v3720_v40 }
 0x1af   :  { %v1788_v49 = vpack.c.bf16 %v1784_v48, %v1784_v48 }
 0x1b1   :  { %2219 = vmatprep.mubr.bf16.mxu0 %v1788_v49 }
 0x1b2   :  { %2220 = vmatmul.mubr.bf16.vlgmr.msra.gmra.mrb[4].mxu0 %v1787_v51 }
 0x1b3   :  { %2229 = vmatpush1.bf16.msra.mxu0 %v3585_v50 }
 0x1b4   :  { %2230 = vmatprep.subr.bf16.mxu0 %v3590_v52 }
 0x1b7   :  { %2231 = vmatpush1.bf16.msra.mxu0 %v3588_v53  ;;  %v3649_v53 = vld [vmem:[%s4211_s7] sm:$0xff]  }
 0x1b8   :  { %2232 = vmatprep.subr.bf16.mxu0 %v3593_v54 }
 0x1bb   :  { %2233 = vmatpush1.bf16.msra.mxu0 %v3591_v55  ;;  %v3653_v55 = vld [vmem:[%s4211_s7 + $0x20] sm:$0xff]  }
 0x1bc   :  { %2234 = vmatprep.subr.bf16.mxu0 %v3596_v56  ;;  %v3654_v56 = vld [vmem:[%s4211_s7 + $0x28] sm:$0xff]  }
 0x1bf   :  { %2235 = vmatpush1.bf16.msra.mxu0 %v3594_v57  ;;  %v3655_v57 = vld [vmem:[%s4211_s7 + $0x30] sm:$0xff]  }
 0x1c0   :  { %2236 = vmatprep.subr.bf16.mxu0 %v3599_v0  ;;  %v3656_v0 = vld [vmem:[%s4211_s7 + $0x38] sm:$0xff]  }
 0x1c3   :  { %2237 = vmatpush1.bf16.msra.mxu0 %v3597_v58  ;;  %v3657_v58 = vld [vmem:[%s4213_s9] sm:$0xff]  }
 0x1c4   :  { %2238 = vmatprep.subr.bf16.mxu0 %v3602_v59  ;;  %v3658_v59 = vld [vmem:[%s4213_s9 + $0x8] sm:$0xff]  }
 0x1c7   :  { %2239 = vmatpush1.bf16.msra.mxu0 %v3600_v60 }
 0x1c8   :  { %2240 = vmatprep.subr.bf16.mxu0 %v3605_v61  ;;  %v3040_v61 = vld [vmem:[%s4210_s6] ss:$0 sm:$0xff] }
 0x1cb   :  { %2241 = vmatpush1.bf16.msra.mxu0 %v3603_v62 }
 0x1cc   :  { %2242 = vmatprep.subr.bf16.mxu0 %v3608_v63 }
 0x1cf   :  { %2243 = vmatpush1.bf16.msra.mxu0 %v3606_v1 }
 0x1d0   :  { %2244 = vmatprep.subr.bf16.mxu0 %v3611_v2 }
 0x1d3   :  { %2245 = vmatpush1.bf16.msra.mxu0 %v3609_v3 }
 0x1d4   :  { %2246 = vmatprep.subr.bf16.mxu0 %v3614_v4 }
 0x1d7   :  { %2247 = vmatpush1.bf16.msra.mxu0 %v3612_v5 }
 0x1d8   :  { %2248 = vmatprep.subr.bf16.mxu0 %v3617_v6  ;;  %v3659_v6 = vld [vmem:[%s4213_s9 + $0x10] sm:$0xff]  }
 0x1db   :  { %2249 = vmatpush1.bf16.msra.mxu0 %v3615_v7  ;;  %v3660_v7 = vld [vmem:[%s4213_s9 + $0x18] sm:$0xff]  }
 0x1dc   :  { %2250 = vmatprep.subr.bf16.mxu0 %v3620_v8  ;;  %v3661_v8 = vld [vmem:[%s4215_s11] sm:$0xff]  }
 0x1df   :  { %2251 = vmatpush1.bf16.msra.mxu0 %v3618_v9  ;;  %v3057_v9 = vld [vmem:[%s4212_s8] ss:$0 sm:$0xff] }
 0x1e0   :  { %2252 = vmatprep.subr.bf16.mxu0 %v3623_v10 }
 0x1e3   :  { %2253 = vmatpush1.bf16.msra.mxu0 %v3621_v11 }
 0x1e4   :  { %2254 = vmatprep.subr.bf16.mxu0 %v3626_v12 }
 0x1e7   :  { %2255 = vmatpush1.bf16.msra.mxu0 %v3624_v15 }
 0x1e8   :  { %v1776_v20 = vpop.f32.mrb[4].mxu1  ;;  %2256 = vmatprep.subr.bf16.mxu0 %v3629_v18  ;;  %v3662_v18 = vld [vmem:[%s4215_s11 + $0x8] sm:$0xff]  }
 0x1e9   :  { %v3159_v22 = vadd.f32 %v1776_v20, %v301_v17  ;;  %v1778_v23 = vpop.f32.mrb[5].mxu1 }
 0x1ea   :  { %v3160_v24 = vadd.f32 %v1778_v23, %v305_v19  ;;  %v1780_v25 = vpop.f32.mrb[6].mxu1  ;;  %v3066_v19 = vld [vmem:[%s4214_s10] ss:$0 sm:$0xff]  ;;  %s3722_s10 = smov [#allocation5]  }
 0x1eb   :  { %v1781_v26 = vpop.f32.mrb[7].mxu1  ;;  %2257 = vmatpush1.bf16.msra.mxu0 %v3627_v21  ;;  %v1785_v29 = vmax.f32 %v3159_v22, 0.0  ;;  %s2736_s11 = sshll.u32 %s3722_s10, 4  ;;  %s2737_s11 = int_to_ptr.vmem [resolvable:$true] %s2736_s11 }
 0x1ec   :  { %v1786_v27 = vmax.f32 %v3160_v24, 0.0  ;;  %2258 = vmatprep.subr.bf16.mxu0 %v3632_v16  ;;  %v2716_v26 = vand.u32 127, %v290_v32  ;;  %p3695_p9 = scmp.lt.s32.totalorder %s2737_s11, %s2737_s11 }
 0x1ed   :  { %v1789_v31 = vpack.c.bf16 %v1785_v29, %v1785_v29 }
 0x1ee   :  { %v1790_v30 = vpack.c.bf16 %v1786_v27, %v1786_v27  ;;  %v3072_v27 = vld [vmem:[%s4216_s12] ss:$0 sm:$0xff]  ;;  %vm2717_vm3 = vcmp.lt.s32.totalorder %v2716_v26, 10  ;;  %s3690_s12 = scalar_lea.vmem %s2737_s11, 128 }
 0x1ef   :  { %2259 = vmatpush1.bf16.msra.mxu0 %v3630_v28  ;;  %p3691_p8 = scmp.ne.s32.totalorder %s2737_s11, %s3690_s12  ;;  %p3696_p10 = scmp.lt.s32.totalorder %s3690_s12, %s3690_s12 }
 0x1f0   :  { %2260 = vmatprep.mubr.bf16.mxu0 %v1790_v30  ;;  %3135 = vmatprep.subr.bf16.mxu0 %v3720_v40 }
 0x1f1   :  { %p3697_p11 = por %p3696_p10, %p3695_p9 }
 0x1f2   :  { %2261 = vmatmul.mubr.bf16.vlgmr.msra.gmra.mrb[4].mxu0 %v1789_v31 }
 0x1f3   :  { %3143 = vmatprep.mubr.msk.bf16.mxu0 %vm3721_vm0, %v3720_v40  ;;  %3136 = vmatpush3.bf16.msra.mxu0 %v3657_v58  ;;  %p3698_p12 = pnand %p3697_p11, %p3691_p8 }
 0x1f4   :  { %3137 = vmatprep.subr.bf16.mxu0 %v3720_v40 }
 0x1f7   :  { %3138 = vmatpush3.bf16.msra.mxu0 %v3658_v59 }
 0x1f8   :  { %3139 = vmatprep.subr.bf16.mxu0 %v3720_v40 }
 0x1fb   :  { %3140 = vmatpush3.bf16.msra.mxu0 %v3659_v6 }
 0x1fc   :  { %3141 = vmatprep.subr.bf16.mxu0 %v3720_v40 }
 0x1ff   :  { %3142 = vmatpush3.bf16.msra.mxu0 %v3660_v7 }
 0x2c5   :  { %v2262_v44 = vpop.f32.mrb[4].mxu0 }
 0x2c6   :  { %v3161_v45 = vadd.f32 %v2262_v44, %v1860_v42  ;;  %v2264_v46 = vpop.f32.mrb[5].mxu0 }
 0x2c7   :  { %v3162_v47 = vadd.f32 %v2264_v46, %v1864_v43  ;;  %v2266_v48 = vpop.f32.mrb[6].mxu0 }
 0x2c8   :  { %v2269_v49 = vmax.f32 %v3161_v45, 0.0  ;;  %v2267_v50 = vpop.f32.mrb[7].mxu0 }
 0x2c9   :  { %v2270_v51 = vmax.f32 %v3162_v47, 0.0 }
 0x2ca   :  { %v2271_v54 = vpack.c.bf16 %v2269_v49, %v2269_v49 }
 0x2cb   :  { %v2272_v52 = vpack.c.bf16 %v2270_v51, %v2270_v51 }
 0x2cd   :  { %2440 = vmatprep.mubr.bf16.mxu1 %v2272_v52 }
 0x2ce   :  { %2441 = vmatmul.mubr.bf16.vlgmr.msra.gmra.mrb[8].mxu1 %v2271_v54 }
 0x2cf   :  { %3116 = vmatpush3.bf16.msra.mxu1 %v3649_v53  ;;  %3131 = vmatprep.mubr.msk.bf16.mxu1 %vm3721_vm0, %v3720_v40 }
 0x2d0   :  { %3117 = vmatprep.subr.bf16.mxu1 %v3720_v40 }
 0x2d3   :  { %3118 = vmatpush3.bf16.msra.mxu1 %v3650_v33 }
 0x2d4   :  { %3119 = vmatprep.subr.bf16.mxu1 %v3720_v40 }
 0x2d7   :  { %3120 = vmatpush3.bf16.msra.mxu1 %v3651_v34 }
 0x2d8   :  { %3121 = vmatprep.subr.bf16.mxu1 %v3720_v40 }
 0x2db   :  { %3122 = vmatpush3.bf16.msra.mxu1 %v3652_v36 }
 0x2dc   :  { %3123 = vmatprep.subr.bf16.mxu1 %v3720_v40 }
 0x2df   :  { %3124 = vmatpush3.bf16.msra.mxu1 %v3653_v55 }
 0x2e0   :  { %3125 = vmatprep.subr.bf16.mxu1 %v3720_v40 }
 0x2e3   :  { %3126 = vmatpush3.bf16.msra.mxu1 %v3654_v56 }
 0x2e4   :  { %3127 = vmatprep.subr.bf16.mxu1 %v3720_v40 }
 0x2e7   :  { %3128 = vmatpush3.bf16.msra.mxu1 %v3655_v57 }
 0x2e8   :  { %3129 = vmatprep.subr.bf16.mxu1 %v3720_v40 }
 0x2eb   :  { %3130 = vmatpush3.bf16.msra.mxu1 %v3656_v0 }
 0x2ec   :  { %3147 = vmatprep.subr.bf16.mxu1 %v3720_v40 }
 0x3a1   :  { %v3092_v60 = vpop.f32.mrb[8].mxu1 }
 0x3a2   :  { %v3093_v62 = vpop.f32.mrb[9].mxu1 }
 0x3a3   :  { %v3094_v63 = vadd.f32 %v3093_v62, %v3092_v60  ;;  %v3095_v1 = vpop.f32.mrb[10].mxu1 }
 0x3a4   :  { %v3096_v2 = vpop.f32.mrb[11].mxu1 }
 0x3a5   :  { %v2443_v3 = vadd.f32 %v3094_v63, %v3040_v61 }
 0x3a7   :  { %v2448_v4 = vmax.f32 %v2443_v3, 0.0 }
 0x3a9   :  { %v2449_v5 = vpack.c.bf16 %v2448_v4, %v2448_v4 }
 0x3ab   :  { %3132 = vmatmul.mubr.bf16.vlgmr.msra.gmra.mrb[12].mxu1 %v2449_v5 }
 0x3ac   :  { %3151 = vmatprep.mubr.msk.bf16.mxu1 %vm3721_vm0, %v3720_v40  ;;  %3148 = vmatpush3.bf16.msra.mxu1 %v3661_v8 }
 0x3ad   :  { %3149 = vmatprep.subr.bf16.mxu1 %v3720_v40 }
 0x3b0   :  { %3150 = vmatpush3.bf16.msra.mxu1 %v3662_v18 }
 0x47e   :  { %v2555_v10 = vpop.f32.mrb[12].mxu1 }
 0x47f   :  { %v2556_v11 = vadd.f32 %v3057_v9, %v2555_v10  ;;  %v3133_v12 = vpop.f32.mrb[13].mxu1 }
 0x480   :  { %v2558_v13 = vpop.f32.mrb[14].mxu1 }
 0x481   :  { %v2561_v14 = vmax.f32 %v2556_v11, 0.0  ;;  %v3134_v15 = vpop.f32.mrb[15].mxu1 }
 0x483   :  { %v2562_v17 = vpack.c.bf16 %v2561_v14, %v2561_v14 }
 0x485   :  { %3144 = vmatmul.mubr.msk.bf16.vlgmr.msra.gmra.mrb[8].mxu0 %vm2602_vm1, %v2562_v17 }
 0x558   :  { %v2640_v20 = vpop.f32.mrb[8].mxu0 }
 0x559   :  { %v2641_v21 = vadd.f32 %v3066_v19, %v2640_v20  ;;  %v3145_v22 = vpop.f32.mrb[9].mxu0 }
 0x55a   :  { %v2643_v23 = vpop.f32.mrb[10].mxu0 }
 0x55b   :  { %v2646_v16 = vmax.f32 %v2641_v21, 0.0  ;;  %v3146_v24 = vpop.f32.mrb[11].mxu0 }
 0x55d   :  { %v2647_v25 = vpack.c.bf16 %v2646_v16, %v2646_v16 }
 0x55f   :  { %3152 = vmatmul.mubr.msk.bf16.vlgmr.msra.gmra.mrb[16].mxu1 %vm2671_vm2, %v2647_v25 }
 0x632   :  { %v2709_v28 = vpop.f32.mrb[16].mxu1 }
 0x633   :  { %v2710_v29 = vadd.f32 %v3072_v27, %v2709_v28  ;;  %v3153_v30 = vpop.f32.mrb[17].mxu1 }
 0x634   :  { %v2712_v31 = vpop.f32.mrb[18].mxu1 }
 0x635   :  { %v3154_v35 = vpop.f32.mrb[19].mxu1  ;;  %v2718_v37 = vsel %vm2717_vm3, %v2710_v29, -inf }
 0x636   :  { %2719 = vmax.xlane.f32.xlu0 %v2718_v37 }
 0x6c3   :  { %v2720_v38 = vpop.xlane.xlu0 %2719 }
 0x6c4   :  { %v2721_v39 = vsub.f32 %v2718_v37, %v2720_v38 }
 0x6c6   :  { %v2722_v40 = vmul.f32 1.442695, %v2721_v39 }
 0x6c8   :  { %3663 = vpow2.f32 %v2722_v40 }
 0x6d2   :  { %v3664_v41 = vpop.eup %3663 }
 0x6d3   :  { %2724 = vadd.xlane.f32.xlu0 %v3664_v41 }
 0x760   :  { %v2725_v42 = vpop.xlane.xlu0 %2724 }
 0x761   :  { %3665 = vlog2.f32 %v2725_v42 }
 0x76b   :  { %v3666_v32 = vpop.eup %3665 }
 0x76c   :  { %v2727_v43 = vmul.f32 0.6931472, %v3666_v32 }
 0x76e   :  { %v2728_v44 = vsub.f32 %v2721_v39, %v2727_v43 }
 0x770   :  { %2729 = vst [vmem:[#allocation5] sm:$0xff] %v2728_v44 }
 0x771   :  { %3701 = shalt.err (!%p3698_p12)
}
 0x772   :  { %s3702_s2 = scalar_lea.hbm %s4217_s13, 128 }
 0x773   :  { %p3703_p13 = scmp.ne.s32.totalorder %s4217_s13, %s3702_s2  ;;  %p3706_p0 = scmp.lt.u32.totalorder %s3702_s2, %s4217_s13 }
 0x775   :  { %p3708_p1 = pnand %p3706_p0, %p3703_p13 }
 0x777   :  { %3711 = shalt.err (!%p3708_p1)
}
 0x778   :  { %2739 = dma.vmem_to_hbm [thread:$0]  %s2737_s11, 128, %s4217_s13, [#allocation4]  }
 0x779   :  { %3714 = dma.done.wait [#allocation4], 128  }
 0x77a   :  { %3715 = vsyncadd [#allocation4], 4294967168 }
 0x77b   :  { %2743 = vsyncpa [#allocation3], 1 }
 0x77c   :  { %2744 = vsyncpa [#allocation4], 1 }

</bundles_post_ra>
